<compile_context>
chip_gen: v7x
topology: tpu7x:2x2x1
jax: 0.10.0
libtpu: 0.0.40
codegen_flags: <defaults>
</compile_context>

<pallas_src>
import functools

import jax
import jax.numpy as jnp
import numpy as np
from jax.experimental import pallas as pl
from jax.experimental.pallas import tpu as pltpu


def _base_oc_kernel(q_ref, x_ref, k_ref, v_ref, weff_ref, wpx_ref, beff_ref,
                    out_ref, m_sc, acc_sc, *,
                    tk, n_valid, kv_resident, use_bf16_exp):
    ki = pl.program_id(2)
    nk = pl.num_programs(2)

    @pl.when(ki == 0)
    def _():
        m_sc[...] = jnp.full_like(m_sc, -jnp.inf)
        acc_sc[...] = jnp.zeros_like(acc_sc)

    if kv_resident:
        # K/V are resident per batch; slice the current KV tile out of VMEM.
        start = pl.multiple_of(ki * tk, tk)
        k = k_ref[0, :, pl.ds(start, tk)]                     # (Kc, TK)   bf16
        v = v_ref[0, :, pl.ds(start, tk)]                     # (Vc+1, TK) bf16
    else:
        k = k_ref[0]                                          # (Kc, TK)   bf16
        v = v_ref[0]                                          # (Vc+1, TK) bf16

    q = q_ref[0]                                              # (Kc, TQ)   bf16

    # sim[j, i] = sum_kc k[kc, j] * q[kc, i]  -> (TK, TQ), contraction-major.
    sim = jax.lax.dot_general(k, q, (((0,), (0,)), ((), ())),
                              preferred_element_type=jnp.float32)

    if n_valid is not None:
        # Mask padded key columns (N was padded up to a multiple of the tile).
        kv_idx = jax.lax.broadcasted_iota(jnp.int32, (k.shape[1], 1), 0) + ki * tk
        sim = jnp.where(kv_idx < n_valid, sim, -jnp.inf)

    # Online softmax over the KV axis; stats are lane-dense (1, TQ) f32.
    m_prev = m_sc[...]
    m_new = jnp.maximum(m_prev, jnp.max(sim, axis=0, keepdims=True))     # (1, TQ)
    alpha = jnp.exp(m_prev - m_new)                                      # (1, TQ) f32
    if use_bf16_exp:
        p = jnp.exp((sim - m_new).astype(jnp.bfloat16))                  # bf16 EUP
    else:
        p = jnp.exp(sim - m_new).astype(jnp.bfloat16)                    # f32 EUP (v5e)

    # V has an appended all-ones row, so this single MXU matmul also produces
    # sum(p) as the last accumulator row (no XLU cross-sublane reduce).
    acc_sc[...] = alpha * acc_sc[...] + jnp.dot(
        v, p, preferred_element_type=jnp.float32)                        # (Vc+1, TQ)
    m_sc[...] = m_new

    @pl.when(ki == nk - 1)
    def _():
        vcp1 = acc_sc.shape[0]
        # Normalize: last accumulator row is the softmax denominator l.
        ctx = acc_sc[0:vcp1 - 1, :] * pl.reciprocal(
            acc_sc[vcp1 - 1:vcp1, :], approx=True)                       # (Vc, TQ) f32
        # project(concat([W(ctx), x])) with W folded into project (w_eff/b_eff).
        out = (jnp.dot(weff_ref[...], ctx.astype(jnp.bfloat16),
                       preferred_element_type=jnp.float32)
               + jnp.dot(wpx_ref[...], x_ref[0],
                         preferred_element_type=jnp.float32)
               + beff_ref[...])                                          # (Cout, TQ)
        out_ref[0] = jnp.maximum(out, 0.0).astype(out_ref.dtype)


def _round_up(n, m):
    return ((n + m - 1) // m) * m


def _pick_tile(n, cap):
    """Largest multiple-of-128 divisor of n that is <= cap (n is a multiple of 128)."""
    best, t = 128, 128
    while t <= min(cap, n):
        if n % t == 0:
            best = t
        t += 128
    return best


def base_oc_forward(x, params, *, tq=None, tk=None, kv_resident=None,
                    out_dtype=jnp.float32):
    """x: (B, C, W, H, D) float32 (PyTorch NCDHW).  Returns (B, Cout, W, H, D)."""
    B, C, W, H, D = x.shape
    N = W * H * D
    Kc = params["wk"].shape[0]
    Vc = params["wv"].shape[0]
    Cout = params["w_eff"].shape[0]

    # ---- generation-aware knobs --------------------------------------------
    kind = jax.devices()[0].device_kind.lower()
    is_v7 = "v7" in kind
    use_bf16_exp = ("v6" in kind) or is_v7        # v5e and older: no bf16 EUP
    vmem_limit = (40 << 20) if is_v7 else (64 << 20)
    resident_budget = (20 << 20) if is_v7 else (48 << 20)
    tq_cap = 1024                                 # tk stays small; tq divides KV restream

    # ---- pad N up to a tile-friendly size (tail keys masked in-kernel) -----
    n_pad = _round_up(N, 128)
    if n_pad >= 256:
        n_pad = _round_up(N, 256)
    if tq is None:
        tq = _pick_tile(n_pad, tq_cap)
    if tk is None:
        tk = min(256, n_pad)
    assert tq % 128 == 0 and n_pad % tq == 0, (tq, n_pad)
    assert tk % 128 == 0 and n_pad % tk == 0, (tk, n_pad)

    xb = x.reshape(B, C, N).astype(jnp.bfloat16)
    if n_pad != N:
        xb = jnp.pad(xb, ((0, 0), (0, 0), (0, n_pad - N)))

    # ---- precompute Q(=K) and V projections ONCE (plain XLA einsums) -------
    f32 = jnp.float32
    q = jnp.maximum(
        jnp.einsum("kc,bcn->bkn", params["wk"], xb, preferred_element_type=f32)
        + params["bk"][None], 0.0).astype(jnp.bfloat16)                 # (B, Kc, Np)
    v = (jnp.einsum("vc,bcn->bvn", params["wv"], xb, preferred_element_type=f32)
         + params["bv"][None]).astype(jnp.bfloat16)                      # (B, Vc, Np)
    # Extra all-ones row so the p.V matmul also yields sum(p).
    v_ext = jnp.concatenate(
        [v, jnp.ones((B, 1, n_pad), jnp.bfloat16)], axis=1)              # (B, Vc+1, Np)

    # ---- resident vs streamed KV -------------------------------------------
    kv_vmem = 2 * (Kc + Vc + 1) * n_pad * 2       # x2 for double buffering
    if kv_resident is None:
        kv_resident = kv_vmem <= resident_budget

    grid = (B, n_pad // tq, n_pad // tk)

    in_specs = [
        pl.BlockSpec((1, Kc, tq), lambda b, qi, ki: (b, 0, qi)),          # Q tile
        pl.BlockSpec((1, C, tq), lambda b, qi, ki: (b, 0, qi)),           # x tile (epilogue)
    ]
    if kv_resident:
        in_specs += [
            pl.BlockSpec((1, Kc, n_pad), lambda b, qi, ki: (b, 0, 0)),        # K resident / batch
            pl.BlockSpec((1, Vc + 1, n_pad), lambda b, qi, ki: (b, 0, 0)),    # V resident / batch
        ]
    else:
        in_specs += [
            pl.BlockSpec((1, Kc, tk), lambda b, qi, ki: (b, 0, ki),
                         pipeline_mode=pl.Buffered(3)),                       # K tile stream
            pl.BlockSpec((1, Vc + 1, tk), lambda b, qi, ki: (b, 0, ki),
                         pipeline_mode=pl.Buffered(3)),                       # V tile stream
        ]
    in_specs += [
        pl.BlockSpec((Cout, Vc), lambda b, qi, ki: (0, 0)),               # w_eff = wpc @ ww
        pl.BlockSpec((Cout, C), lambda b, qi, ki: (0, 0)),                # wpx (x half of project)
        pl.BlockSpec((Cout, 1), lambda b, qi, ki: (0, 0)),                # b_eff
    ]

    flops = int(2 * B * n_pad * n_pad * (Kc + Vc + 1)
                + 2 * B * n_pad * Cout * (Vc + C))
    kv_bytes = B * (Kc + Vc + 1) * n_pad * 2 * (1 if kv_resident else n_pad // tq)
    bytes_accessed = int(kv_bytes
                         + B * (Kc + C) * n_pad * 2
                         + B * Cout * n_pad * np.dtype(out_dtype).itemsize
                         + 4096)

    kernel = functools.partial(
        _base_oc_kernel, tk=tk,
        n_valid=(N if n_pad != N else None),
        kv_resident=kv_resident, use_bf16_exp=use_bf16_exp)

    out = pl.pallas_call(
        kernel,
        out_shape=jax.ShapeDtypeStruct((B, Cout, n_pad), out_dtype),
        grid_spec=pltpu.PrefetchScalarGridSpec(
            num_scalar_prefetch=0,
            grid=grid,
            in_specs=in_specs,
            out_specs=pl.BlockSpec((1, Cout, tq), lambda b, qi, ki: (b, 0, qi)),
            scratch_shapes=[
                pltpu.VMEM((1, tq), jnp.float32),         # running max m
                pltpu.VMEM((Vc + 1, tq), jnp.float32),    # [context ; l] accumulator
            ],
        ),
        compiler_params=pltpu.CompilerParams(
            dimension_semantics=("parallel", "parallel", "arbitrary"),
            vmem_limit_bytes=vmem_limit),
        cost_estimate=pl.CostEstimate(
            flops=flops, transcendentals=int(B * n_pad * n_pad),
            bytes_accessed=bytes_accessed),
    )(q, xb, q, v_ext, params["w_eff"], params["wpx"], params["b_eff"])

    if n_pad != N:
        out = out[:, :, :N]
    return out.reshape(B, Cout, W, H, D)


def init_params(key, in_channels, out_channels, key_channels, value_channels,
                eps=1e-5, zero_init_w=True):
    """1x1x1 conv weights stored output-major (Cout, Cin); biases (Cout, 1).
    Eval-mode BatchNorm3d (identity running stats), the key_channels**-0.5
    attention scale, and the W conv (folded into project) are all folded in."""
    ks = jax.random.split(key, 8)
    wk = jax.random.normal(ks[0], (key_channels, in_channels), jnp.float32) * 0.1
    bk = jax.random.normal(ks[1], (key_channels, 1), jnp.float32) * 0.1
    wv = jax.random.normal(ks[2], (value_channels, in_channels), jnp.float32) * 0.1
    bv = jax.random.normal(ks[3], (value_channels, 1), jnp.float32) * 0.1
    if zero_init_w:
        # nn.init.constant_(W.weight, 0) / constant_(W.bias, 0) as in the module
        ww = jnp.zeros((out_channels, value_channels), jnp.float32)
        bw = jnp.zeros((out_channels, 1), jnp.float32)
    else:
        ww = jax.random.normal(ks[4], (out_channels, value_channels), jnp.float32) * 0.1
        bw = jax.random.normal(ks[5], (out_channels, 1), jnp.float32) * 0.1
    wp = jax.random.normal(ks[6], (out_channels, out_channels + in_channels),
                           jnp.float32) * 0.1
    bp = jax.random.normal(ks[7], (out_channels, 1), jnp.float32) * 0.1

    # Fold BN (eval: gamma=1, beta=0, mean=0, var=1) into f_key and project.
    bn = 1.0 / float(np.sqrt(1.0 + eps))
    wk_f, bk_f = wk * bn, bk * bn
    wp_f, bp_f = wp * bn, bp * bn

    # Fold key_channels**-0.5 into f_key==f_query (ReLU commutes with s > 0).
    s = float(key_channels) ** -0.25
    wk_f, bk_f = wk_f * s, bk_f * s

    wpc = wp_f[:, :out_channels]      # project columns multiplying `context`
    wpx = wp_f[:, out_channels:]      # project columns multiplying `x`

    # Fold the W conv into the project conv (both linear -> exact).
    w_eff = wpc @ ww                  # (Cout, Vc)
    b_eff = wpc @ bw + bp_f           # (Cout, 1)

    bf = lambda a: a.astype(jnp.bfloat16)
    return dict(wk=bf(wk_f), bk=bk_f, wv=bf(wv), bv=bv,
                w_eff=bf(w_eff), wpx=bf(wpx), b_eff=b_eff)


def _ref_forward(x, params):
    """Pure-JAX reference with matching bf16 matmul operands (f32 accumulate)."""
    B, C, W, H, D = x.shape
    N = W * H * D
    f32, bf = jnp.float32, jnp.bfloat16
    Cout = params["w_eff"].shape[0]
    xb = x.reshape(B, C, N).astype(bf)
    q = jnp.maximum(
        jnp.einsum("kc,bcn->bkn", params["wk"], xb, preferred_element_type=f32)
        + params["bk"][None], 0.0).astype(bf)
    value = (jnp.einsum("vc,bcn->bvn", params["wv"], xb, preferred_element_type=f32)
             + params["bv"][None]).astype(bf)
    sim = jnp.einsum("bki,bkj->bij", q, q, preferred_element_type=f32)   # (B, Nq, Nk)
    attn = jax.nn.softmax(sim, axis=-1)
    ctx = jnp.einsum("bij,bvj->bvi", attn.astype(bf), value,
                     preferred_element_type=f32)                          # (B, Vc, Nq)
    out = jnp.maximum(
        jnp.einsum("ov,bvi->boi", params["w_eff"], ctx.astype(bf),
                   preferred_element_type=f32)
        + jnp.einsum("oc,bci->boi", params["wpx"], xb, preferred_element_type=f32)
        + params["b_eff"][None], 0.0)
    return out.reshape(B, Cout, W, H, D)


if __name__ == "__main__":
    B = 2
    in_channels = 8
    out_channels = 8        # must equal in_channels for concat+project consistency
    key_channels = 8
    value_channels = 8

    root = jax.random.PRNGKey(0)
    kx, kp = jax.random.split(root)
    # Use non-zero W so the attention path is actually exercised by the check
    # (the real module zero-inits W; pass zero_init_w=True for init parity).
    params = init_params(kp, in_channels, out_channels, key_channels,
                         value_channels, zero_init_w=False)

    # Case 1: 8^3 volume (N=512), resident K/V, multi-tile grid (2, 2, 2).
    x1 = jax.random.normal(kx, (B, in_channels, 8, 8, 8), jnp.float32)
    out1 = jax.block_until_ready(base_oc_forward(x1, params, tq=256, tk=256))
    ref1 = _ref_forward(x1, params)
    np.testing.assert_allclose(np.asarray(out1), np.asarray(ref1),
                               rtol=2e-2, atol=2e-2)
    assert out1.shape == (B, out_channels, 8, 8, 8)

    # Case 2: same input, forced streamed-KV path (3-deep buffered KV pipeline).
    out2 = jax.block_until_ready(
        base_oc_forward(x1, params, tq=128, tk=128, kv_resident=False))
    np.testing.assert_allclose(np.asarray(out2), np.asarray(ref1),
                               rtol=2e-2, atol=2e-2)

    # Case 3: odd 5^3 volume (N=125) -> padded to 128 with in-kernel key masking.
    x2 = jax.random.normal(jax.random.PRNGKey(1), (B, in_channels, 5, 5, 5),
                           jnp.float32)
    out3 = jax.block_until_ready(base_oc_forward(x2, params))
    ref3 = _ref_forward(x2, params)
    np.testing.assert_allclose(np.asarray(out3), np.asarray(ref3),
                               rtol=2e-2, atol=2e-2)

    print("KERNEL_OK")
</pallas_src>

<mosaic_0001>
module attributes {stable_mosaic.version = 11 : i64} {
  func.func @_base_oc_kernel(%arg0: i32, %arg1: i32, %arg2: i32, %arg3: memref<1x8x256xbf16, #tpu.memory_space<vmem>>, %arg4: memref<1x8x256xbf16, #tpu.memory_space<vmem>>, %arg5: memref<1x8x512xbf16, #tpu.memory_space<vmem>>, %arg6: memref<1x9x512xbf16, #tpu.memory_space<vmem>>, %arg7: memref<8x8xbf16, #tpu.memory_space<vmem>>, %arg8: memref<8x8xbf16, #tpu.memory_space<vmem>>, %arg9: memref<8x1xf32, #tpu.memory_space<vmem>>, %arg10: memref<1x8x256xf32, #tpu.memory_space<vmem>>, %arg11: memref<1x256xf32, #tpu.memory_space<vmem>>, %arg12: memref<9x256xf32, #tpu.memory_space<vmem>>) attributes {dimension_semantics = [#tpu.dimension_semantics<parallel>, #tpu.dimension_semantics<parallel>, #tpu.dimension_semantics<arbitrary>], iteration_bounds = array<i64: 2, 2, 2>, scalar_prefetch = 0 : i64, scratch_operands = 2 : i64, tpu.core_type = #tpu.core_type<tc>, window_params = [{transform_indices = @transform_0, window_bounds = array<i64: 1, 8, 256>}, {transform_indices = @transform_1, window_bounds = array<i64: 1, 8, 256>}, {transform_indices = @transform_2, window_bounds = array<i64: 1, 8, 512>}, {transform_indices = @transform_3, window_bounds = array<i64: 1, 9, 512>}, {pipeline_mode = #tpu.pipeline_mode<synchronous>, transform_indices = @transform_4, window_bounds = array<i64: 8, 8>}, {pipeline_mode = #tpu.pipeline_mode<synchronous>, transform_indices = @transform_5, window_bounds = array<i64: 8, 8>}, {pipeline_mode = #tpu.pipeline_mode<synchronous>, transform_indices = @transform_6, window_bounds = array<i64: 8, 1>}, {transform_indices = @transform_7, window_bounds = array<i64: 1, 8, 256>}]} {
    %c0_i32 = arith.constant 0 : i32
    %0 = arith.cmpi eq, %arg2, %c0_i32 : i32
    %1 = arith.extui %0 : i1 to i32
    %c0_i32_0 = arith.constant 0 : i32
    %2 = arith.cmpi ne, %1, %c0_i32_0 : i32
    scf.if %2 {
      %cst_18 = arith.constant 0xFF800000 : f32
      %34 = vector.broadcast %cst_18 : f32 to vector<1x256xf32>
      %c0_19 = arith.constant 0 : index
      %c0_20 = arith.constant 0 : index
      %35 = vector.load %arg11[%c0_19, %c0_20] : memref<1x256xf32, #tpu.memory_space<vmem>>, vector<1x256xf32>
      tpu.vector_store %arg11[%c0_19, %c0_20], %34 {strides = array<i32>} : memref<1x256xf32, #tpu.memory_space<vmem>>, vector<1x256xf32>,
      %cst_21 = arith.constant 0.000000e+00 : f32
      %36 = vector.broadcast %cst_21 : f32 to vector<9x256xf32>
      %c0_22 = arith.constant 0 : index
      %c0_23 = arith.constant 0 : index
      %37 = vector.load %arg12[%c0_22, %c0_23] : memref<9x256xf32, #tpu.memory_space<vmem>>, vector<9x256xf32>
      tpu.vector_store %arg12[%c0_22, %c0_23], %36 {strides = array<i32>} : memref<9x256xf32, #tpu.memory_space<vmem>>, vector<9x256xf32>,
    } else {
    }
    %c256_i32 = arith.constant 256 : i32
    %3 = arith.muli %arg2, %c256_i32 : i32
    %4 = tpu.assume_multiple %3, 256 : i32
    %c0 = arith.constant 0 : index
    %c0_1 = arith.constant 0 : index
    %5 = arith.index_cast %4 : i32 to index
    %6 = vector.load %arg5[%c0, %c0_1, %5] : memref<1x8x512xbf16, #tpu.memory_space<vmem>>, vector<1x8x256xbf16>
    %7 = vector.shape_cast %6 : vector<1x8x256xbf16> to vector<8x256xbf16>
    %c0_2 = arith.constant 0 : index
    %c0_3 = arith.constant 0 : index
    %8 = arith.index_cast %4 : i32 to index
    %9 = vector.load %arg6[%c0_2, %c0_3, %8] : memref<1x9x512xbf16, #tpu.memory_space<vmem>>, vector<1x9x256xbf16>
    %10 = vector.shape_cast %9 : vector<1x9x256xbf16> to vector<9x256xbf16>
    %c0_4 = arith.constant 0 : index
    %c0_5 = arith.constant 0 : index
    %c0_6 = arith.constant 0 : index
    %11 = vector.load %arg3[%c0_4, %c0_5, %c0_6] : memref<1x8x256xbf16, #tpu.memory_space<vmem>>, vector<1x8x256xbf16>
    %12 = vector.shape_cast %11 : vector<1x8x256xbf16> to vector<8x256xbf16>
    %cst = arith.constant dense<0.000000e+00> : vector<256x256xf32>
    %13 = tpu.matmul %7, %12, %cst {dimension_numbers = #tpu.dot_dimension_numbers<[0], [0], [1], [1], [0, 1, 1, 1], [], []>} : vector<8x256xbf16>, vector<8x256xbf16>, vector<256x256xf32> -> vector<256x256xf32>
    %c0_7 = arith.constant 0 : index
    %c0_8 = arith.constant 0 : index
    %14 = vector.load %arg11[%c0_7, %c0_8] : memref<1x256xf32, #tpu.memory_space<vmem>>, vector<1x256xf32>
    %cst_9 = arith.constant dense<0xFF800000> : vector<256xf32>
    %15 = vector.multi_reduction <maximumf>, %13, %cst_9 [0] : vector<256x256xf32> to vector<256xf32>
    %16 = vector.shape_cast %15 : vector<256xf32> to vector<1x256xf32>
    %17 = arith.maximumf %14, %16 : vector<1x256xf32>
    %18 = arith.subf %14, %17 : vector<1x256xf32>
    %19 = math.exp %18 : vector<1x256xf32>
    %20 = vector.broadcast %17 : vector<1x256xf32> to vector<256x256xf32>
    %21 = arith.subf %13, %20 : vector<256x256xf32>
    %22 = math.exp %21 : vector<256x256xf32>
    %23 = arith.truncf %22 : vector<256x256xf32> to vector<256x256xbf16>
    %c0_10 = arith.constant 0 : index
    %c0_11 = arith.constant 0 : index
    %24 = vector.load %arg12[%c0_10, %c0_11] : memref<9x256xf32, #tpu.memory_space<vmem>>, vector<9x256xf32>
    %25 = vector.broadcast %19 : vector<1x256xf32> to vector<9x256xf32>
    %26 = arith.mulf %25, %24 : vector<9x256xf32>
    %cst_12 = arith.constant dense<0.000000e+00> : vector<9x256xf32>
    %27 = tpu.matmul %10, %23, %cst_12 {dimension_numbers = #tpu.dot_dimension_numbers<[1], [0], [0], [1], [0, 0, 1, 1], [], []>} : vector<9x256xbf16>, vector<256x256xbf16>, vector<9x256xf32> -> vector<9x256xf32>
    %28 = arith.addf %26, %27 : vector<9x256xf32>
    %c0_13 = arith.constant 0 : index
    %c0_14 = arith.constant 0 : index
    %29 = vector.load %arg12[%c0_13, %c0_14] : memref<9x256xf32, #tpu.memory_space<vmem>>, vector<9x256xf32>
    tpu.vector_store %arg12[%c0_13, %c0_14], %28 {strides = array<i32>} : memref<9x256xf32, #tpu.memory_space<vmem>>, vector<9x256xf32>,
    %c0_15 = arith.constant 0 : index
    %c0_16 = arith.constant 0 : index
    %30 = vector.load %arg11[%c0_15, %c0_16] : memref<1x256xf32, #tpu.memory_space<vmem>>, vector<1x256xf32>
    tpu.vector_store %arg11[%c0_15, %c0_16], %17 {strides = array<i32>} : memref<1x256xf32, #tpu.memory_space<vmem>>, vector<1x256xf32>,
    %c1_i32 = arith.constant 1 : i32
    %31 = arith.cmpi eq, %arg2, %c1_i32 : i32
    %32 = arith.extui %31 : i1 to i32
    %c0_i32_17 = arith.constant 0 : i32
    %33 = arith.cmpi ne, %32, %c0_i32_17 : i32
    scf.if %33 {
      %c0_18 = arith.constant 0 : index
      %c0_19 = arith.constant 0 : index
      %34 = vector.load %arg12[%c0_18, %c0_19] : memref<9x256xf32, #tpu.memory_space<vmem>>, vector<8x256xf32>
      %c8 = arith.constant 8 : index
      %c0_20 = arith.constant 0 : index
      %35 = vector.load %arg12[%c8, %c0_20] : memref<9x256xf32, #tpu.memory_space<vmem>>, vector<1x256xf32>
      %36 = tpu.reciprocal %35 {approx = true} : vector<1x256xf32> -> vector<1x256xf32>
      %37 = vector.broadcast %36 : vector<1x256xf32> to vector<8x256xf32>
      %38 = arith.mulf %34, %37 : vector<8x256xf32>
      %c0_21 = arith.constant 0 : index
      %c0_22 = arith.constant 0 : index
      %39 = vector.load %arg7[%c0_21, %c0_22] : memref<8x8xbf16, #tpu.memory_space<vmem>>, vector<8x8xbf16>
      %40 = arith.truncf %38 : vector<8x256xf32> to vector<8x256xbf16>
      %cst_23 = arith.constant dense<0.000000e+00> : vector<8x256xf32>
      %41 = tpu.matmul %39, %40, %cst_23 {dimension_numbers = #tpu.dot_dimension_numbers<[1], [0], [0], [1], [0, 0, 1, 1], [], []>} : vector<8x8xbf16>, vector<8x256xbf16>, vector<8x256xf32> -> vector<8x256xf32>
      %c0_24 = arith.constant 0 : index
      %c0_25 = arith.constant 0 : index
      %42 = vector.load %arg8[%c0_24, %c0_25] : memref<8x8xbf16, #tpu.memory_space<vmem>>, vector<8x8xbf16>
      %c0_26 = arith.constant 0 : index
      %c0_27 = arith.constant 0 : index
      %c0_28 = arith.constant 0 : index
      %43 = vector.load %arg4[%c0_26, %c0_27, %c0_28] : memref<1x8x256xbf16, #tpu.memory_space<vmem>>, vector<1x8x256xbf16>
      %44 = vector.shape_cast %43 : vector<1x8x256xbf16> to vector<8x256xbf16>
      %cst_29 = arith.constant dense<0.000000e+00> : vector<8x256xf32>
      %45 = tpu.matmul %42, %44, %cst_29 {dimension_numbers = #tpu.dot_dimension_numbers<[1], [0], [0], [1], [0, 0, 1, 1], [], []>} : vector<8x8xbf16>, vector<8x256xbf16>, vector<8x256xf32> -> vector<8x256xf32>
      %46 = arith.addf %41, %45 : vector<8x256xf32>
      %c0_30 = arith.constant 0 : index
      %c0_31 = arith.constant 0 : index
      %47 = vector.load %arg9[%c0_30, %c0_31] : memref<8x1xf32, #tpu.memory_space<vmem>>, vector<8x1xf32>
      %48 = vector.broadcast %47 : vector<8x1xf32> to vector<8x256xf32>
      %49 = arith.addf %46, %48 : vector<8x256xf32>
      %cst_32 = arith.constant 0.000000e+00 : f32
      %50 = vector.broadcast %cst_32 : f32 to vector<8x256xf32>
      %51 = arith.maximumf %49, %50 : vector<8x256xf32>
      %c0_33 = arith.constant 0 : index
      %c0_34 = arith.constant 0 : index
      %c0_35 = arith.constant 0 : index
      %52 = vector.load %arg10[%c0_33, %c0_34, %c0_35] : memref<1x8x256xf32, #tpu.memory_space<vmem>>, vector<1x8x256xf32>
      %53 = vector.shape_cast %52 : vector<1x8x256xf32> to vector<8x256xf32>
      %54 = vector.shape_cast %51 : vector<8x256xf32> to vector<1x8x256xf32>
      tpu.vector_store %arg10[%c0_33, %c0_34, %c0_35], %54 {strides = array<i32>} : memref<1x8x256xf32, #tpu.memory_space<vmem>>, vector<1x8x256xf32>,
    } else {
    }
    return
  }
  func.func @transform_0(%arg0: i32, %arg1: i32, %arg2: i32) -> (i32, i32, i32) {
    %c0_i32 = arith.constant 0 : i32
    %c0_i32_0 = arith.constant 0 : i32
    return %arg0, %c0_i32, %arg1 : i32, i32, i32
  }
  func.func @transform_1(%arg0: i32, %arg1: i32, %arg2: i32) -> (i32, i32, i32) {
    %c0_i32 = arith.constant 0 : i32
    %c0_i32_0 = arith.constant 0 : i32
    return %arg0, %c0_i32, %arg1 : i32, i32, i32
  }
  func.func @transform_2(%arg0: i32, %arg1: i32, %arg2: i32) -> (i32, i32, i32) {
    %c0_i32 = arith.constant 0 : i32
    %c0_i32_0 = arith.constant 0 : i32
    %c0_i32_1 = arith.constant 0 : i32
    return %arg0, %c0_i32, %c0_i32_0 : i32, i32, i32
  }
  func.func @transform_3(%arg0: i32, %arg1: i32, %arg2: i32) -> (i32, i32, i32) {
    %c0_i32 = arith.constant 0 : i32
    %c0_i32_0 = arith.constant 0 : i32
    %c0_i32_1 = arith.constant 0 : i32
    return %arg0, %c0_i32, %c0_i32_0 : i32, i32, i32
  }
  func.func @transform_4(%arg0: i32, %arg1: i32, %arg2: i32) -> (i32, i32) {
    %c0_i32 = arith.constant 0 : i32
    %c0_i32_0 = arith.constant 0 : i32
    %c0_i32_1 = arith.constant 0 : i32
    return %c0_i32, %c0_i32_0 : i32, i32
  }
  func.func @transform_5(%arg0: i32, %arg1: i32, %arg2: i32) -> (i32, i32) {
    %c0_i32 = arith.constant 0 : i32
    %c0_i32_0 = arith.constant 0 : i32
    %c0_i32_1 = arith.constant 0 : i32
    return %c0_i32, %c0_i32_0 : i32, i32
  }
  func.func @transform_6(%arg0: i32, %arg1: i32, %arg2: i32) -> (i32, i32) {
    %c0_i32 = arith.constant 0 : i32
    %c0_i32_0 = arith.constant 0 : i32
    %c0_i32_1 = arith.constant 0 : i32
    return %c0_i32, %c0_i32_0 : i32, i32
  }
  func.func @transform_7(%arg0: i32, %arg1: i32, %arg2: i32) -> (i32, i32, i32) {
    %c0_i32 = arith.constant 0 : i32
    %c0_i32_0 = arith.constant 0 : i32
    return %arg0, %c0_i32, %arg1 : i32, i32, i32
  }
}

</mosaic_0001>

<bundles_post_ra>
// kernel: tpu_custom_call.1
= control target key start
LH: loop header
LB: loop body
LE: loop exit
PB: predicated region body
PF: predicated region fallthrough
CT: control target
= control target key end

     0   :  { %s3472_s0 = inlined_call_operand.hbm [shape: bf16[2,8,512], index: 0, kind: input, shape index: {}]   ;;  %s3473_s1 = inlined_call_operand.hbm [shape: bf16[2,8,512], index: 1, kind: input, shape index: {}]   ;;  %s3474_s2 = inlined_call_operand.hbm [shape: bf16[2,8,512], index: 2, kind: input, shape index: {}]   ;;  %s3475_s3 = inlined_call_operand.hbm [shape: bf16[2,9,512], index: 3, kind: input, shape index: {}]   ;;  %s3476_s4 = inlined_call_operand.hbm [shape: bf16[8,8], index: 4, kind: input, shape index: {}]   ;;  %s3477_s5 = inlined_call_operand.hbm [shape: bf16[8,8], index: 5, kind: input, shape index: {}]   ;;  %s3478_s6 = inlined_call_operand.hbm [shape: f32[8,1], index: 6, kind: input, shape index: {}]   ;;  %s3479_s7 = inlined_call_operand.hbm [shape: f32[2,8,512], index: 7, kind: output, shape index: {}]  }
   0x1   :  { %3555 = sst [smem:[#allocation66_spill]] %s3473_s1 }
   0x2   :  { %3556 = sst [smem:[#allocation67_spill]] %s3476_s4 }
   0x3   :  { %3557 = sst [smem:[#allocation68_spill]] %s3477_s5 }
   0x4   :  { %3558 = sst [smem:[#allocation69_spill]] %s3479_s7 }
   0x5   :  { %12 = vsyncpa [#allocation5], 0 }
   0x6   :  { %14 = vsyncpa [#allocation5 + $0x1], 0 }
   0x7   :  { %15 = vsyncpa [#allocation8], 0 }
   0x8   :  { %17 = vsyncpa [#allocation8 + $0x1], 0 }
   0x9   :  { %18 = vsyncpa [#allocation11], 0 }
   0xa   :  { %20 = vsyncpa [#allocation11 + $0x1], 0 }
   0xb   :  { %21 = vsyncpa [#allocation14], 0 }
   0xc   :  { %22 = vsyncpa [#allocation6], 0 }
   0xd   :  { %24 = vsyncpa [#allocation6 + $0x1], 0  ;;  %s2371_s24 = smov 0   ;;  %s2373_s25 = smov 0  }
   0xe   :  { %s2375_s26 = smov 0   ;;  %s2377_s27 = smov 0  }
   0xf   :  { %s2379_s28 = smov 0   ;;  %s2381_s29 = smov 0  }
  0x10   :  { %s2383_s30 = smov 0   ;;  %s2385_s8 = smov 0  }
  0x11   :  { %s2387_s9 = smov 0   ;;  %s2389_s10 = smov 0  }
  0x12   :  { %s2391_s11 = smov 0   ;;  %s2393_s12 = smov 0  }
  0x13   :  { %s2395_s13 = smov 0  }
  0x14 LB: > { %3559 = sst [smem:[#allocation24_spill]] %s2270_s25  ;;  %s2435_s14 = sadd.s32 4294967295, %s2314_s13   ;;  %s2314_s13 = sphi %s2395_s13, %s30_s13   ;;  %s2310_s12 = sphi %s2393_s12, %s3765_s12   ;;  %s2306_s11 = sphi %s2391_s11, %s3755_s11   ;;  %s2302_s10 = sphi %s2389_s10, %s3754_s10   ;;  %s2298_s9 = sphi %s2387_s9, %s3764_s9   ;;  %s2294_s8 = sphi %s2385_s8, %s3753_s8   ;;  %s2290_s30 = sphi %s2383_s30, %s3763_s30   ;;  %s2286_s29 = sphi %s2381_s29, %s3762_s29   ;;  %s2282_s28 = sphi %s2379_s28, %s3761_s28   ;;  %s2278_s27 = sphi %s2377_s27, %s3760_s27   ;;  %s2274_s26 = sphi %s2375_s26, %s3759_s26   ;;  %s2270_s25 = sphi %s2373_s25, %s3758_s25   ;;  %s2266_s24 = sphi %s2371_s24, %s3749_s24  }
  0x15   : > { %3560 = sst [smem:[#allocation25_spill]] %s2278_s27  ;;  %p125_p0 = scmp.ne.s32.totalorder %s2270_s25, %s2266_s24 }
  0x16   : > { %3561 = sst [smem:[#allocation26_spill]] %s2290_s30  ;;  %p3481_p1 = scmp.eq.s32.totalorder %s2435_s14, 0 }
  0x17   : > { %3562 = sst [smem:[#allocation27_spill]] %s2294_s8  ;;  %p1569_p2 = scmp.ge.s32.totalorder %s2314_s13, 1 }
  0x18   : > { %3563 = sst [smem:[#allocation28_spill]] %s2298_s9  ;;  %p253_p3 = scmp.lt.s32.totalorder %s2314_s13, 9 }
  0x19   : > { %3564 = sst [smem:[#allocation29_spill]] %s2302_s10  ;;  %p2443_p4 = por %p125_p0, %p3481_p1 }
  0x1a   : > { %3565 = sst [smem:[#allocation30_spill]] %s2306_s11  ;;  %p2447_p5 = pnand %p1569_p2, %p253_p3 }
  0x1b   : > { %s3566_s15 = scalar_select %p2443_p4, 1, 0 }
  0x1c   : > { %s3568_s16 = scalar_select %p2447_p5, 1, 0 }
  0x1d   : > { %3567 = sst [smem:[#allocation31_spill]] %s3566_s15  ;;  %s2316_s17 = smov [#allocation12]  }
  0x1e   : > { %s266_s18 = sshll.u32 %s2316_s17, 4  ;;  %p1661_p6 = pneg %p2447_p5  ;;  %s267_s18 = int_to_ptr.vmem [resolvable:$true] %s266_s18 }
  0x1f   : > { %s2317_s19 = smov [#allocation13]   ;;  %s3570_s4 = sld [smem:[#allocation67_spill]] }
  0x20   : > { %s277_s20 = sshll.u32 %s2317_s19, 4  ;;  %p2455_p7 = pnand %p1661_p6, %p3481_p1  ;;  %s2459_s20 = int_to_ptr.vmem [resolvable:$true] %s277_s20 }
  0x22   : > { %s3569_s21 = scalar_select %p2455_p7, 1, 0 }
  0x23   : > { %p2469_p9 = pneg %p2455_p7 }
  0x25   : > { %s1952_s24 = scalar_lea.hbm %s3570_s4, 64 }
  0x26   : > { %p1953_p8 = scmp.ne.s32.totalorder %s3570_s4, %s1952_s24  ;;  %p1959_p12 = scmp.lt.u32.totalorder %s1952_s24, %s3570_s4 }
  0x28   : > { %p1955_p10 = pnand %p2469_p9, %p1953_p8 }
  0x2a   : > { %p1956_p11 = pneg %p1955_p10 }
  0x2c   : > { %p1961_p13 = pnand %p1959_p12, %p1956_p11 }
  0x2e   : > { %1964 = shalt.err (!%p1961_p13)
}
  0x2f   : > { %s1965_s22 = scalar_lea.vmem %s267_s18, 64  ;;  %p1973_p6 = scmp.lt.s32.totalorder %s267_s18, %s267_s18 }
  0x30   : > { %p1966_p0 = scmp.ne.s32.totalorder %s267_s18, %s1965_s22  ;;  %p1974_p1 = scmp.lt.s32.totalorder %s1965_s22, %s1965_s22 }
  0x32   : > { %p1968_p2 = pnand %p1966_p0, %p2469_p9  ;;  %p1975_p4 = por %p1974_p1, %p1973_p6 }
  0x34   : > { %p1969_p3 = pneg %p1968_p2 }
  0x36   : > { %p1976_p5 = pnand %p1975_p4, %p1969_p3 }
  0x38   : > { %1979 = shalt.err (!%p1976_p5)
}
  0x39   : > { %1664 = dma.hbm_to_vmem [thread:$0]  (!%p2455_p7), %s3570_s4, 64, %s267_s18, [#allocation11]  }
  0x3a   : > { %s3572_s5 = sld [smem:[#allocation68_spill]] }
  0x40   : > { %s1980_s24 = scalar_lea.hbm %s3572_s5, 64 }
  0x41   : > { %p1981_p8 = scmp.ne.s32.totalorder %s3572_s5, %s1980_s24  ;;  %p1987_p4 = scmp.lt.u32.totalorder %s1980_s24, %s3572_s5 }
  0x43   : > { %p1983_p10 = pnand %p1981_p8, %p2469_p9 }
  0x45   : > { %p1984_p1 = pneg %p1983_p10 }
  0x47   : > { %p1989_p5 = pnand %p1987_p4, %p1984_p1 }
  0x49   : > { %1992 = shalt.err (!%p1989_p5)
}
  0x4a   : > { %s1993_s18 = scalar_lea.vmem %s2459_s20, 64  ;;  %p2001_p0 = scmp.lt.s32.totalorder %s2459_s20, %s2459_s20 }
  0x4b   : > { %p1994_p11 = scmp.ne.s32.totalorder %s2459_s20, %s1993_s18  ;;  %p2002_p2 = scmp.lt.s32.totalorder %s1993_s18, %s1993_s18 }
  0x4d   : > { %p1996_p12 = pnand %p1994_p11, %p2469_p9  ;;  %p2003_p3 = por %p2002_p2, %p2001_p0 }
  0x4f   : > { %p1997_p13 = pneg %p1996_p12 }
  0x51   : > { %p2004_p6 = pnand %p2003_p3, %p1997_p13 }
  0x53   : > { %2007 = shalt.err (!%p2004_p6)
}
  0x54   : > { %1667 = dma.hbm_to_vmem [thread:$0]  (!%p2455_p7), %s3572_s5, 64, %s2459_s20, [#allocation14]  }
  0x55   : > { %s1568_s7 = sadd.s32 4294967294, %s2314_s13   ;;  %s42_s9 = sadd.s32 1, %s2302_s10 }
  0x56   : > { %p43_p8 = scmp.ge.s32.totalorder %s42_s9, 2  ;;  %s45_s8 = sadd.s32 1, %s2306_s11 }
  0x57   : > { %s49_s23 = sadd.s32 1, %s2310_s12  ;;  %s58_s24 = sadd.s32 1, %s2286_s29 }
  0x58   : > { %s3767_s9 = smov (%p43_p8, %s42_s9), 0  ;;  %s3769_s8 = smov (!%p43_p8, %s45_s8), %s2306_s11 }
  0x59   : > { %3573 = sst [smem:[#allocation32_spill]] %s3767_s9  ;;  %p65_p10 = scmp.ne.s32.totalorder %s2286_s29, %s2282_s28 }
  0x5a   : > { %p66_p1 = scmp.eq.s32.totalorder %s2314_s13, 0  ;;  %p47_p4 = scmp.ge.s32.totalorder %s3769_s8, 2 }
  0x5b   : > { %p71_p5 = scmp.ne.s32.totalorder %s2282_s28, %s2278_s27  ;;  %s112_s19 = sadd.s32 1, %s2274_s26 }
  0x5c   : > { %p2526_p11 = por %p66_p1, %p65_p10  ;;  %s3771_s8 = smov (%p47_p4, %s3769_s8), 0 }
  0x5d   : > { %3575 = sst [smem:[#allocation33_spill]] %s3771_s8  ;;  %s3773_s23 = smov (!%p47_p4, %s49_s23), %s2310_s12 }
  0x5e   : > { %s54_s22 = ssub.s32 %s2306_s11, %s3771_s8  ;;  %p3576_p12 = scmp.eq.s32.totalorder %s2435_s14, 0 }
  0x5f   : > { %p51_p0 = scmp.ge.s32.totalorder %s3773_s23, 2  ;;  %p119_p2 = scmp.ne.s32.totalorder %s2274_s26, %s2270_s25 }
  0x60   : > { %p2541_p13 = por %p3576_p12, %p71_p5  ;;  %p240_p3 = scmp.eq.s32.totalorder %s2435_s14, 7 }
  0x61   : > { %p246_p6 = scmp.eq.s32.totalorder %s1568_s7, 7  ;;  %s3775_s23 = smov (%p51_p0, %s3773_s23), 0 }
  0x62   : > { %s3577_s18 = scalar_select %p2541_p13, 1, 0 }
  0x63   : > { %3578 = sst [smem:[#allocation34_spill]] %s3775_s23  ;;  %p2552_p8 = por %p119_p2, %p66_p1 }
  0x64   : > { %p2559_p4 = por %p240_p3, %p65_p10  ;;  %s53_s4 = ssub.s32 %s2310_s12, %s3775_s23 }
  0x65   : > { %p2568_p12 = por %p246_p6, %p71_p5  ;;  %s55_s5 = sor.u32 %s54_s22, %s53_s4 }
  0x66   : > { %s3580_s15 = scalar_select %p2559_p4, 1, 0 }
  0x67   : > { %s3582_s7 = scalar_select %p2568_p12, 1, 0 }
  0x68   : > { %3581 = sst [smem:[#allocation35_spill]] %s3580_s15  ;;  %p110_p0 = scmp.eq.s32.totalorder %s53_s4, 0 }
  0x69   : > { %p56_p1 = scmp.eq.s32.totalorder %s55_s5, 0  ;;  %p1691_p2 = scmp.lt.s32.totalorder %s2314_s13, 8 }
  0x6a   : > { %s2574_s8 = scalar_select %p110_p0, %s2274_s26, %s112_s19  }
  0x6b   : > { %s2577_s9 = scalar_select %p56_p1, %s2286_s29, %s58_s24  }
  0x6c   : > { %3583 = sst [smem:[#allocation36_spill]] %s2574_s8  ;;  %s3494_s10 = sand.u32 1, %s2286_s29  }
  0x6d   : > { %3584 = sst [smem:[#allocation37_spill]] %s2577_s9  ;;  %s1575_s15 = sshll.u32 %s2306_s11, 1 }
  0x6e   : > { %s2583_s23 = sshll.u32 %s3494_s10, 3  ;;  %s1576_s27 = sshll.u32 %s2310_s12, 2 }
  0x6f   : > { %s2586_s25 = sadd.s32 %s1576_s27, %s1575_s15  ;;  %p2592_p10 = pnand %p1691_p2, %p2526_p11 }
  0x70   : > { %s3496_s5 = sshll.u32 %s2586_s25, 6  ;;  %s3499_s24 = sand.u32 1, %s2314_s13  }
  0x71   : > { %s3586_s1 = sld [smem:[#allocation66_spill]]  ;;  %s324_s27 = scalar_lea.vmem [#allocation7], %s2583_s23 }
  0x72   : > { %s334_s20 = sshll.u32 %s324_s27, 4  ;;  %p2610_p5 = pnand %p1691_p2, %p2552_p8  ;;  %s2614_s20 = int_to_ptr.vmem [resolvable:$true] %s334_s20 }
  0x73   : > { %s2618_s11 = scalar_lea.sflag [#allocation8], %s3499_s24  ;;  %p3502_p3 = pneg %p2592_p10 }
  0x74   : > { %s3587_s15 = scalar_select %p2610_p5, 1, 0 }
  0x77   : > { %s2603_s10 = scalar_lea.hbm %s3586_s1, %s3496_s5  ;;  %s2013_s27 = scalar_lea.hbm %s3586_s1, 512 }
  0x78   : > { %s2008_s19 = scalar_lea.hbm %s2603_s10, 128  ;;  %p2014_p8 = scmp.lt.u32.totalorder %s2603_s10, %s3586_s1 }
  0x79   : > { %p2009_p11 = scmp.ne.s32.totalorder %s2603_s10, %s2008_s19  ;;  %p2015_p1 = scmp.lt.u32.totalorder %s2013_s27, %s2008_s19 }
  0x7a   : > { %p2017_p12 = scmp.lt.u32.totalorder %s2008_s19, %s2603_s10 }
  0x7b   : > { %p2011_p6 = pnand %p3502_p3, %p2009_p11  ;;  %p2016_p2 = por %p2015_p1, %p2014_p8 }
  0x7d   : > { %p2012_p0 = pneg %p2011_p6  ;;  %p2018_p4 = por %p2017_p12, %p2016_p2 }
  0x7f   : > { %p2019_p13 = pnand %p2018_p4, %p2012_p0 }
  0x81   : > { %2022 = shalt.err (!%p2019_p13)
}
  0x82   : > { %s2023_s24 = scalar_lea.vmem %s2614_s20, 128  ;;  %s2318_s22 = smov [#allocation7]  }
  0x83   : > { %p2024_p11 = scmp.ne.s32.totalorder %s2614_s20, %s2023_s24  ;;  %s2028_s30 = sshll.u32 %s2318_s22, 4  ;;  %s2029_s30 = int_to_ptr.vmem [resolvable:$false] %s2028_s30 }
  0x84   : > { %s2030_s9 = scalar_lea.vmem %s2029_s30, 256  ;;  %p2031_p7 = scmp.lt.s32.totalorder %s2614_s20, %s2029_s30 }
  0x85   : > { %p2026_p6 = pnand %p2024_p11, %p3502_p3  ;;  %p2032_p8 = scmp.lt.s32.totalorder %s2030_s9, %s2023_s24 }
  0x87   : > { %p2027_p5 = pneg %p2026_p6  ;;  %p2033_p1 = por %p2032_p8, %p2031_p7 }
  0x89   : > { %p2034_p12 = pnand %p2033_p1, %p2027_p5 }
  0x8b   : > { %2037 = shalt.err (!%p2034_p12)
}
  0x8c   : > { %1677 = dma.hbm_to_vmem [thread:$0]  (!%p2592_p10), %s2603_s10, 128, %s2614_s20, %s2618_s11  }
  0x8d   : > { %s2319_s5 = smov [#allocation15]   ;;  %s2038_s22 = scalar_lea.hbm %s3478_s6, 128 }
  0x8e   : > { %s288_s19 = sshll.u32 %s2319_s5, 4  ;;  %p2039_p7 = scmp.ne.s32.totalorder %s3478_s6, %s2038_s22  ;;  %s289_s19 = int_to_ptr.vmem [resolvable:$true] %s288_s19 }
  0x8f   : > { %p2045_p5 = scmp.lt.u32.totalorder %s2038_s22, %s3478_s6 }
  0x90   : > { %p2041_p13 = pnand %p2039_p7, %p2469_p9 }
  0x92   : > { %p2042_p4 = pneg %p2041_p13 }
  0x94   : > { %p2047_p0 = pnand %p2045_p5, %p2042_p4 }
  0x96   : > { %2050 = shalt.err (!%p2047_p0)
}
  0x97   : > { %s2051_s10 = scalar_lea.vmem %s289_s19, 128  ;;  %p2059_p8 = scmp.lt.s32.totalorder %s289_s19, %s289_s19 }
  0x98   : > { %p2052_p2 = scmp.ne.s32.totalorder %s289_s19, %s2051_s10  ;;  %p2060_p1 = scmp.lt.s32.totalorder %s2051_s10, %s2051_s10 }
  0x9a   : > { %p2054_p11 = pnand %p2052_p2, %p2469_p9  ;;  %p2061_p12 = por %p2060_p1, %p2059_p8 }
  0x9c   : > { %p2055_p6 = pneg %p2054_p11 }
  0x9e   : > { %p2062_p3 = pnand %p2061_p12, %p2055_p6 }
  0xa0   : > { %2065 = shalt.err (!%p2062_p3)
}
  0xa1   : > { %p3588_p7 = scmp.ne.s32.totalorder %s3569_s21, 0  ;;  %s3589_s20 = sshll.u32 %s2586_s25, 6 }
  0xa2   : > { %s2669_s27 = scalar_lea.hbm %s3472_s0, %s3589_s20  ;;  %s303_s21 = scalar_lea.vmem [#allocation4], %s2583_s23 }
  0xa3   : > { %1670 = dma.hbm_to_vmem [thread:$0]  (!%p3588_p7), %s3478_s6, 128, %s289_s19, [#allocation14]  }
  0xa4   : > { %s313_s22 = sshll.u32 %s303_s21, 4  ;;  %s343_s30 = sand.u32 1, %s2274_s26   ;;  %s2672_s22 = int_to_ptr.vmem [resolvable:$true] %s313_s22 }
  0xa5   : > { %s3590_s24 = sand.u32 1, %s2286_s29   ;;  %s2066_s10 = scalar_lea.hbm %s2669_s27, 128 }
  0xa6   : > { %s300_s9 = scalar_lea.sflag [#allocation5], %s3590_s24  ;;  %p2067_p9 = scmp.ne.s32.totalorder %s2669_s27, %s2066_s10 }
  0xa7   : > { %p3591_p3 = pneg %p2592_p10  ;;  %s2071_s1 = scalar_lea.hbm %s3472_s0, 512 }
  0xa8   : > { %p2072_p5 = scmp.lt.u32.totalorder %s2669_s27, %s3472_s0  ;;  %p2073_p0 = scmp.lt.u32.totalorder %s2071_s1, %s2066_s10 }
  0xa9   : > { %p2069_p13 = pnand %p2067_p9, %p3591_p3  ;;  %p2075_p11 = scmp.lt.u32.totalorder %s2066_s10, %s2669_s27 }
  0xaa   : > { %p2074_p2 = por %p2073_p0, %p2072_p5 }
  0xab   : > { %p2070_p4 = pneg %p2069_p13 }
  0xac   : > { %p2076_p6 = por %p2075_p11, %p2074_p2 }
  0xae   : > { %p2077_p8 = pnand %p2076_p6, %p2070_p4 }
  0xb0   : > { %2080 = shalt.err (!%p2077_p8)
}
  0xb1   : > { %s2081_s23 = scalar_lea.vmem %s2672_s22, 128  ;;  %p3592_p12 = pmov %p3591_p3 }
  0xb2   : > { %p2082_p1 = scmp.ne.s32.totalorder %s2672_s22, %s2081_s23  ;;  %s2320_s17 = smov [#allocation4]  }
  0xb3   : > { %s2086_s5 = sshll.u32 %s2320_s17, 4  ;;  %s2087_s5 = int_to_ptr.vmem [resolvable:$false] %s2086_s5 }
  0xb4   : > { %p2084_p7 = pnand %p2082_p1, %p3592_p12  ;;  %s2088_s21 = scalar_lea.vmem %s2087_s5, 256 }
  0xb5   : > { %p2089_p3 = scmp.lt.s32.totalorder %s2672_s22, %s2087_s5  ;;  %p2090_p13 = scmp.lt.s32.totalorder %s2088_s21, %s2081_s23 }
  0xb6   : > { %p2085_p9 = pneg %p2084_p7 }
  0xb7   : > { %p2091_p5 = por %p2090_p13, %p2089_p3 }
  0xb9   : > { %p2092_p0 = pnand %p2091_p5, %p2085_p9 }
  0xbb   : > { %2095 = shalt.err (!%p2092_p0)
}
  0xbc   : > { %1674 = dma.hbm_to_vmem [thread:$0]  (!%p2592_p10), %s2669_s27, 128, %s2672_s22, %s300_s9  }
  0xbd   : > { %s1582_s24 = sshll.u32 %s343_s30, 4  ;;  %s1637_s10 = sshll.u32 %s2310_s12, 8 }
  0xbe   : > { %s2706_s1 = scalar_lea.hbm %s3474_s2, %s1637_s10  ;;  %s345_s4 = scalar_lea.vmem [#allocation9], %s1582_s24 }
  0xbf   : > { %s353_s8 = sshll.u32 %s345_s4, 4  ;;  %s2710_s20 = sshll.u32 %s343_s30, 5  ;;  %s354_s8 = int_to_ptr.vmem [resolvable:$true] %s353_s8 }
  0xc0   : > { %s2096_s23 = scalar_lea.hbm %s2706_s1, 256  ;;  %p3593_p4 = scmp.ne.s32.totalorder %s3587_s15, 0 }
  0xc1   : > { %p2097_p10 = scmp.ne.s32.totalorder %s2706_s1, %s2096_s23  ;;  %s2101_s9 = scalar_lea.hbm %s3474_s2, 512 }
  0xc2   : > { %p2098_p2 = pneg %p3593_p4  ;;  %p2102_p8 = scmp.lt.u32.totalorder %s2706_s1, %s3474_s2 }
  0xc3   : > { %p2103_p1 = scmp.lt.u32.totalorder %s2101_s9, %s2096_s23  ;;  %p2105_p7 = scmp.lt.u32.totalorder %s2096_s23, %s2706_s1 }
  0xc4   : > { %p2099_p11 = pnand %p2098_p2, %p2097_p10 }
  0xc5   : > { %p2104_p12 = por %p2103_p1, %p2102_p8 }
  0xc6   : > { %p2100_p6 = pneg %p2099_p11 }
  0xc7   : > { %p2106_p9 = por %p2105_p7, %p2104_p12 }
  0xc9   : > { %p2107_p3 = pnand %p2106_p9, %p2100_p6 }
  0xcb   : > { %2110 = shalt.err (!%p2107_p3)
}
  0xcc   : > { %s2111_s30 = scalar_lea.vmem %s354_s8, 256  ;;  %s2321_s21 = smov [#allocation9]  }
  0xcd   : > { %p2112_p13 = scmp.ne.s32.totalorder %s354_s8, %s2111_s30  ;;  %s2116_s24 = sshll.u32 %s2321_s21, 4  ;;  %s2117_s24 = int_to_ptr.vmem [resolvable:$false] %s2116_s24 }
  0xce   : > { %s2118_s10 = scalar_lea.vmem %s2117_s24, 512  ;;  %p2119_p10 = scmp.lt.s32.totalorder %s354_s8, %s2117_s24 }
  0xcf   : > { %p2114_p5 = pnand %p2112_p13, %p2098_p2  ;;  %p2120_p11 = scmp.lt.s32.totalorder %s2118_s10, %s2111_s30 }
  0xd1   : > { %p2115_p0 = pneg %p2114_p5  ;;  %p2121_p1 = por %p2120_p11, %p2119_p10 }
  0xd3   : > { %p2122_p8 = pnand %p2121_p1, %p2115_p0 }
  0xd5   : > { %2125 = shalt.err (!%p2122_p8)
}
  0xd6   : > { %1680 = dma.hbm_to_vmem [thread:$0]  (!%p3593_p4), %s2706_s1, 256, %s354_s8, %s2618_s11  }
  0xd7   : > { %s364_s25 = scalar_lea.vmem [#allocation10], %s2710_s20  ;;  %s1638_s4 = sshll.u32 %s2310_s12, 9 }
  0xd8   : > { %s371_s19 = sshll.u32 %s364_s25, 4  ;;  %s2741_s22 = scalar_lea.hbm %s3475_s3, %s1638_s4  ;;  %s2736_s19 = int_to_ptr.vmem [resolvable:$true] %s371_s19 }
  0xd9   : > { %s3594_s9 = sand.u32 1, %s2314_s13   ;;  %s2126_s5 = scalar_lea.hbm %s2741_s22, 512 }
  0xda   : > { %s2745_s17 = scalar_lea.sflag [#allocation11], %s3594_s9  ;;  %p2127_p6 = scmp.ne.s32.totalorder %s2741_s22, %s2126_s5 }
  0xdb   : > { %s2131_s8 = scalar_lea.hbm %s3475_s3, 1024  ;;  %p2132_p9 = scmp.lt.u32.totalorder %s2741_s22, %s3475_s3 }
  0xdc   : > { %p2129_p12 = pnand %p2127_p6, %p2098_p2  ;;  %p2133_p3 = scmp.lt.u32.totalorder %s2131_s8, %s2126_s5 }
  0xdd   : > { %p2135_p5 = scmp.lt.u32.totalorder %s2126_s5, %s2741_s22 }
  0xde   : > { %p2130_p7 = pneg %p2129_p12  ;;  %p2134_p13 = por %p2133_p3, %p2132_p9 }
  0xe0   : > { %p2136_p0 = por %p2135_p5, %p2134_p13 }
  0xe2   : > { %p2137_p10 = pnand %p2136_p0, %p2130_p7 }
  0xe4   : > { %2140 = shalt.err (!%p2137_p10)
}
  0xe5   : > { %s2141_s21 = scalar_lea.vmem %s2736_s19, 512  ;;  %s2322_s24 = smov [#allocation10]  }
  0xe6   : > { %p2142_p11 = scmp.ne.s32.totalorder %s2736_s19, %s2141_s21  ;;  %s2146_s10 = sshll.u32 %s2322_s24, 4  ;;  %s2147_s10 = int_to_ptr.vmem [resolvable:$false] %s2146_s10 }
  0xe7   : > { %s2148_s25 = scalar_lea.vmem %s2147_s10, 1024  ;;  %p2149_p6 = scmp.lt.s32.totalorder %s2736_s19, %s2147_s10 }
  0xe8   : > { %p2144_p1 = pnand %p2142_p11, %p2098_p2  ;;  %p2150_p12 = scmp.lt.s32.totalorder %s2148_s25, %s2141_s21 }
  0xea   : > { %p2145_p8 = pneg %p2144_p1  ;;  %p2151_p9 = por %p2150_p12, %p2149_p6 }
  0xec   : > { %p2152_p3 = pnand %p2151_p9, %p2145_p8 }
  0xee   : > { %2155 = shalt.err (!%p2152_p3)
}
  0xef   : > { %s2323_s4 = smov 256   ;;  %s2324_s23 = smov 16  }
  0xf0   : > { %1683 = dma.hbm_to_vmem [thread:$0]  (!%p3593_p4), %s2741_s22, 512, %s2736_s19, %s2745_s17, %s2323_s4, %s2323_s4, %s2324_s23  }
  0xf1   : > { %p3595_p2 = scmp.ne.s32.totalorder %s3568_s16, 0 }
  0xf3   : > { %383 = sbr.rel (%p3595_p2) target bundleno = 1349 (0x545), region = 48 }
  0xfa   : > { %s2774_s27 = sand.u32 1, %s2282_s28   ;;  %p3596_p7 = scmp.ne.s32.totalorder %s3577_s18, 0 }
  0xfb   : > { %s1589_s9 = sshll.u32 %s2774_s27, 3  ;;  %s386_s5 = scalar_lea.sflag [#allocation5], %s2774_s27 }
  0xfc   : > { %s2778_s11 = scalar_lea.vmem [#allocation4], %s1589_s9 }
  0xfd   : > { %2237 = dma.done.wait (%p3596_p7), %s386_s5, 128  }
  0xfe   : > { %2239 = vsyncadd (%p3596_p7), %s386_s5, 4294967168  ;;  %s394_s15 = sand.u32 1, %s2435_s14   ;;  %s2785_s19 = scalar_lea.vmem [#allocation7], %s1589_s9 }
  0xff   : > { %s395_s16 = scalar_lea.sflag [#allocation8], %s394_s15 }
 0x100   : > { %2241 = dma.done.wait (%p3596_p7), %s395_s16, 128  }
 0x101   : > { %2243 = vsyncadd (%p3596_p7), %s395_s16, 4294967168  ;;  %s3597_s22 = sld [smem:[#allocation24_spill]]  ;;  %s3598_s17 = sld [smem:[#allocation31_spill]] }
 0x107   : > { %s405_s1 = sand.u32 1, %s3597_s22   ;;  %p3599_p4 = scmp.ne.s32.totalorder %s3598_s17, 0 }
 0x108   : > { %s2792_s8 = sshll.u32 %s405_s1, 4 }
 0x109   : > { %s407_s20 = scalar_lea.vmem [#allocation9], %s2792_s8 }
 0x10a   : > { %2245 = dma.done.wait (%p3599_p4), %s395_s16, 256  }
 0x10b   : > { %2247 = vsyncadd (%p3599_p4), %s395_s16, 4294967040  ;;  %s2799_s30 = sshll.u32 %s405_s1, 5  ;;  %s413_s21 = scalar_lea.sflag [#allocation11], %s394_s15 }
 0x10c   : > { %s416_s24 = scalar_lea.vmem [#allocation10], %s2799_s30 }
 0x10d   : > { %2249 = dma.done.wait (%p3599_p4), %s413_s21, 512  }
 0x10e   : > { %2251 = vsyncadd (%p3599_p4), %s413_s21, 4294966784  ;;  %p3600_p13 = scmp.eq.s32.totalorder %s2435_s14, 0 }
 0x110   : > { %2253 = dma.done.wait (%p3600_p13), [#allocation11], 64   ;;  %p3601_p5 = pmov %p3600_p13 }
 0x112   : > { %2255 = vsyncadd (%p3601_p5), [#allocation11], 4294967232  ;;  %p3602_p0 = pmov %p3601_p5 }
 0x114   : > { %2257 = dma.done.wait (%p3602_p0), [#allocation14], 192   ;;  %p3603_p10 = pmov %p3602_p0 }
 0x115   : > { %s1596_s18 = sshll.u32 %s2774_s27, 4  ;;  %s3604_s25 = sld [smem:[#allocation26_spill]] }
 0x116   : > { %2259 = vsyncadd (%p3603_p10), [#allocation14], 4294967104  ;;  %s2815_s10 = scalar_lea.vmem [#allocation16], %s1596_s18 }
 0x11b   : > { %p1597_p11 = scmp.ne.s32.totalorder %s3604_s25, 0 }
 0x11c   : > { %v482_v0 = vlaneseq (!%p1597_p11)  ;;  %v2325_v1 = vmov (!%p1597_p11), 0.0   ;;  %v2326_v2 = vmov (!%p1597_p11), -inf  }
 0x11d   : > { %481 = sbr.rel (%p1597_p11) target bundleno = 292 (0x124), region = 80  ;;  %487 = vst [vmem:[#allocation3] sm:$0xff] (!%p1597_p11), %v2325_v1  ;;  %488 = vst [vmem:[#allocation3 + $0x8] sm:$0xff] (!%p1597_p11), %v2325_v1 }
 0x11e   : > { %489 = vst [vmem:[#allocation3 + $0x10] sm:$0x1] (!%p1597_p11), %v2325_v1  ;;  %490 = vst [vmem:[#allocation3 + $0x18] sm:$0x1] (!%p1597_p11), %v2325_v1  ;;  %vm484_vm0 = vcmp.lt.s32.totalorder (!%p1597_p11), %v482_v0, 256 }
 0x11f   : > { %486 = vst.msk [vmem:[#allocation2] sm:$0x3] (!%p1597_p11), %vm484_vm0, %v2326_v2 }
 0x124 PF: > { %s3605_s4 = sld [smem:[#allocation26_spill]]  ;;  %v501_v3 = vld [vmem:[%s2778_s11] sm:$0xff]  ;;  %vm595_vm1 = vcmask 1043456   ;;  %v2327_v6 = vmov 0   ;;  %vm546_vm2 = vcmask 64512  }
 0x125   : > { %v1604_v4 = vcombine.high %v501_v3, %v501_v3  ;;  %v1603_v5 = vcombine.low %v501_v3, %v501_v3  ;;  %634 = vmatprep.mubr.bf16.mxu0 %v2327_v6 }
 0x127   : > { %1605 = vmatprep.subr.msk.bf16.mxu0 %vm595_vm1, %v1604_v4  ;;  %v597_v7 = vsel %vm595_vm1, %v1603_v5, 0 }
 0x128   : > { %603 = vmatpush1.bf16.msra.mxu0 %v597_v7 }
 0x12a   : > { %s1598_s14 = sshll.u32 %s3605_s4, 8  ;;  %p1624_p1 = scmp.ne.s32.totalorder %s3605_s4, 1 }
 0x12b   : > { %s2820_s23 = sshra.s32 %s1598_s14, 7 }
 0x12c   : > { %s1599_s9 = sshll.u32 %s2820_s23, 2 }
 0x12d   : > { %s495_s5 = scalar_lea.vmem %s407_s20, %s1599_s9 [#allocation9]  ;;  %s3037_s11 = scalar_lea.vmem %s416_s24, %s1599_s9 [#allocation10] }
 0x12e   : > { %v496_v8 = vld [vmem:[%s495_s5] sm:$0xff] }
 0x12f   : > { %v1601_v9 = vcombine.low %v496_v8, %v496_v8  ;;  %v1602_v10 = vcombine.high %v496_v8, %v496_v8 }
 0x131   : > { %509 = vxpose.xlu0.c.b16.start.end [1/1] (short) %v1601_v9, 128 }
 0x14e   : > { %525 = vxpose.xlu0.c.b16.start.end [1/1] (short) %v1602_v10, 128 }
 0x197   : > { %v517_v11 = vpop.trf.xlu0 }
 0x198   : > { %1606 = vmatmul.mubr.msk.bf16.vlgmr.msra.gmra.mrb[0].mxu0 %vm546_vm2, %v517_v11 }
 0x199   : > { %644 = vmatprep.mubr.bf16.mxu0 %v2327_v6 }
 0x19b   : > { %v518_v12 = vpop.trf.xlu0 }
 0x19f   : > { %v519_v13 = vpop.trf.xlu0 }
 0x1a0   : > { %1607 = vmatmul.mubr.msk.bf16.gmra.mrb[4].mxu0 %vm546_vm2, %v518_v12 }
 0x1a1   : > { %654 = vmatprep.mubr.bf16.mxu0 %v2327_v6 }
 0x1a3   : > { %v520_v14 = vpop.trf.xlu0 }
 0x1a7   : > { %v521_v15 = vpop.trf.xlu0 }
 0x1a8   : > { %1608 = vmatmul.mubr.msk.bf16.gmra.mrb[8].mxu0 %vm546_vm2, %v519_v13 }
 0x1a9   : > { %664 = vmatprep.mubr.bf16.mxu0 %v2327_v6 }
 0x1ab   : > { %v522_v16 = vpop.trf.xlu0 }
 0x1af   : > { %v523_v17 = vpop.trf.xlu0 }
 0x1b0   : > { %1609 = vmatmul.mubr.msk.bf16.gmra.mrb[12].mxu0 %vm546_vm2, %v520_v14 }
 0x1b1   : > { %674 = vmatprep.mubr.bf16.mxu0 %v2327_v6 }
 0x1b3   : > { %v524_v18 = vpop.trf.xlu0 }
 0x1b7   : > { %v533_v19 = vpop.trf.xlu0 }
 0x1b8   : > { %1610 = vmatmul.mubr.msk.bf16.gmra.mrb[16].mxu0 %vm546_vm2, %v521_v15 }
 0x1b9   : > { %684 = vmatprep.mubr.bf16.mxu0 %v2327_v6 }
 0x1bb   : > { %v534_v20 = vpop.trf.xlu0 }
 0x1bf   : > { %v535_v21 = vpop.trf.xlu0 }
 0x1c0   : > { %1611 = vmatmul.mubr.msk.bf16.gmra.mrb[20].mxu0 %vm546_vm2, %v522_v16 }
 0x1c1   : > { %694 = vmatprep.mubr.bf16.mxu0 %v2327_v6 }
 0x1c3   : > { %v536_v22 = vpop.trf.xlu0 }
 0x1c7   : > { %v537_v23 = vpop.trf.xlu0 }
 0x1c8   : > { %1612 = vmatmul.mubr.msk.bf16.gmra.mrb[24].mxu0 %vm546_vm2, %v523_v17 }
 0x1c9   : > { %704 = vmatprep.mubr.bf16.mxu0 %v2327_v6 }
 0x1cb   : > { %v538_v24 = vpop.trf.xlu0 }
 0x1cf   : > { %v539_v25 = vpop.trf.xlu0 }
 0x1d0   : > { %1613 = vmatmul.mubr.msk.bf16.gmra.mrb[28].mxu0 %vm546_vm2, %v524_v18 }
 0x1d1   : > { %714 = vmatprep.mubr.bf16.mxu0 %v2327_v6 }
 0x1d3   : > { %v540_v26 = vpop.trf.xlu0 }
 0x1d8   : > { %1614 = vmatmul.mubr.msk.bf16.gmra.mrb[32].mxu0 %vm546_vm2, %v533_v19 }
 0x1d9   : > { %724 = vmatprep.mubr.bf16.mxu0 %v2327_v6 }
 0x1e0   : > { %1615 = vmatmul.mubr.msk.bf16.gmra.mrb[36].mxu0 %vm546_vm2, %v534_v20 }
 0x1e1   : > { %734 = vmatprep.mubr.bf16.mxu0 %v2327_v6 }
 0x1e8   : > { %1616 = vmatmul.mubr.msk.bf16.gmra.mrb[40].mxu0 %vm546_vm2, %v535_v21 }
 0x1e9   : > { %744 = vmatprep.mubr.bf16.mxu0 %v2327_v6 }
 0x1f0   : > { %1617 = vmatmul.mubr.msk.bf16.gmra.mrb[44].mxu0 %vm546_vm2, %v536_v22 }
 0x1f1   : > { %754 = vmatprep.mubr.bf16.mxu0 %v2327_v6 }
 0x1f8   : > { %1618 = vmatmul.mubr.msk.bf16.gmra.mrb[48].mxu0 %vm546_vm2, %v537_v23 }
 0x1f9   : > { %764 = vmatprep.mubr.bf16.mxu0 %v2327_v6 }
 0x200   : > { %1619 = vmatmul.mubr.msk.bf16.gmra.mrb[52].mxu0 %vm546_vm2, %v538_v24 }
 0x201   : > { %774 = vmatprep.mubr.bf16.mxu0 %v2327_v6 }
 0x208   : > { %1620 = vmatmul.mubr.msk.bf16.gmra.mrb[56].mxu0 %vm546_vm2, %v539_v25 }
 0x209   : > { %784 = vmatprep.mubr.bf16.mxu0 %v2327_v6 }
 0x210   : > { %1621 = vmatmul.mubr.msk.bf16.gmra.mrb[60].mxu0 %vm546_vm2, %v540_v26 }
 0x26b   : > { %v2845_v27 = vpop.f32.mrb[0].mxu0 }
 0x26c   : > { %v2847_v28 = vpop.f32.mrb[1].mxu0 }
 0x26d   : > { %v2849_v29 = vpop.f32.mrb[2].mxu0 }
 0x26e   : > { %v2851_v30 = vpop.f32.mrb[3].mxu0 }
 0x273   : > { %v2853_v31 = vpop.f32.mrb[4].mxu0 }
 0x274   : > { %v796_v32 = vmax.f32 %v2845_v27, %v2853_v31  ;;  %v2857_v33 = vpop.f32.mrb[5].mxu0 }
 0x275   : > { %v833_v34 = vmax.f32 %v2847_v28, %v2857_v33  ;;  %v2861_v35 = vpop.f32.mrb[6].mxu0 }
 0x276   : > { %v797_v36 = vmax.f32 %v2849_v29, %v2861_v35  ;;  %v2865_v37 = vpop.f32.mrb[7].mxu0 }
 0x277   : > { %v834_v38 = vmax.f32 %v2851_v30, %v2865_v37 }
 0x27b   : > { %v2869_v39 = vpop.f32.mrb[8].mxu0 }
 0x27c   : > { %v798_v40 = vmax.f32 %v796_v32, %v2869_v39  ;;  %v2872_v41 = vpop.f32.mrb[9].mxu0 }
 0x27d   : > { %v835_v42 = vmax.f32 %v833_v34, %v2872_v41  ;;  %v2875_v43 = vpop.f32.mrb[10].mxu0 }
 0x27e   : > { %v799_v44 = vmax.f32 %v797_v36, %v2875_v43  ;;  %v2878_v45 = vpop.f32.mrb[11].mxu0 }
 0x27f   : > { %v836_v46 = vmax.f32 %v834_v38, %v2878_v45 }
 0x283   : > { %v2881_v47 = vpop.f32.mrb[12].mxu0 }
 0x284   : > { %v800_v48 = vmax.f32 %v798_v40, %v2881_v47  ;;  %v2884_v49 = vpop.f32.mrb[13].mxu0 }
 0x285   : > { %v837_v50 = vmax.f32 %v835_v42, %v2884_v49  ;;  %v2887_v51 = vpop.f32.mrb[14].mxu0 }
 0x286   : > { %v801_v52 = vmax.f32 %v799_v44, %v2887_v51  ;;  %v2890_v53 = vpop.f32.mrb[15].mxu0 }
 0x287   : > { %v838_v54 = vmax.f32 %v836_v46, %v2890_v53 }
 0x28b   : > { %v2893_v55 = vpop.f32.mrb[16].mxu0 }
 0x28c   : > { %v802_v56 = vmax.f32 %v800_v48, %v2893_v55  ;;  %v2896_v57 = vpop.f32.mrb[17].mxu0 }
 0x28d   : > { %v839_v58 = vmax.f32 %v837_v50, %v2896_v57  ;;  %v2899_v59 = vpop.f32.mrb[18].mxu0 }
 0x28e   : > { %v803_v60 = vmax.f32 %v801_v52, %v2899_v59  ;;  %v2902_v61 = vpop.f32.mrb[19].mxu0 }
 0x28f   : > { %v840_v62 = vmax.f32 %v838_v54, %v2902_v61 }
 0x293   : > { %v2905_v63 = vpop.f32.mrb[20].mxu0 }
 0x294   : > { %v804_v0 = vmax.f32 %v802_v56, %v2905_v63  ;;  %v2908_v1 = vpop.f32.mrb[21].mxu0 }
 0x295   : > { %v841_v2 = vmax.f32 %v839_v58, %v2908_v1  ;;  %v2911_v3 = vpop.f32.mrb[22].mxu0 }
 0x296   : > { %v805_v4 = vmax.f32 %v803_v60, %v2911_v3  ;;  %v2914_v5 = vpop.f32.mrb[23].mxu0 }
 0x297   : > { %v842_v6 = vmax.f32 %v840_v62, %v2914_v5 }
 0x29b   : > { %v2917_v7 = vpop.f32.mrb[24].mxu0 }
 0x29c   : > { %v806_v8 = vmax.f32 %v804_v0, %v2917_v7  ;;  %v2920_v9 = vpop.f32.mrb[25].mxu0 }
 0x29d   : > { %v843_v10 = vmax.f32 %v841_v2, %v2920_v9  ;;  %v2923_v11 = vpop.f32.mrb[26].mxu0 }
 0x29e   : > { %v807_v12 = vmax.f32 %v805_v4, %v2923_v11  ;;  %v2926_v13 = vpop.f32.mrb[27].mxu0 }
 0x29f   : > { %v844_v14 = vmax.f32 %v842_v6, %v2926_v13 }
 0x2a3   : > { %v2929_v15 = vpop.f32.mrb[28].mxu0 }
 0x2a4   : > { %v808_v16 = vmax.f32 %v806_v8, %v2929_v15  ;;  %v2932_v17 = vpop.f32.mrb[29].mxu0 }
 0x2a5   : > { %v845_v18 = vmax.f32 %v843_v10, %v2932_v17  ;;  %v2935_v19 = vpop.f32.mrb[30].mxu0 }
 0x2a6   : > { %v809_v20 = vmax.f32 %v807_v12, %v2935_v19  ;;  %v2938_v21 = vpop.f32.mrb[31].mxu0 }
 0x2a7   : > { %v846_v22 = vmax.f32 %v844_v14, %v2938_v21 }
 0x2ab   : > { %v2941_v23 = vpop.f32.mrb[32].mxu0 }
 0x2ac   : > { %v810_v24 = vmax.f32 %v808_v16, %v2941_v23  ;;  %v2944_v25 = vpop.f32.mrb[33].mxu0 }
 0x2ad   : > { %v847_v26 = vmax.f32 %v845_v18, %v2944_v25  ;;  %v2947_v32 = vpop.f32.mrb[34].mxu0 }
 0x2ae   : > { %v811_v34 = vmax.f32 %v809_v20, %v2947_v32  ;;  %v2950_v36 = vpop.f32.mrb[35].mxu0 }
 0x2af   : > { %v848_v38 = vmax.f32 %v846_v22, %v2950_v36 }
 0x2b3   : > { %v2953_v40 = vpop.f32.mrb[36].mxu0 }
 0x2b4   : > { %v812_v42 = vmax.f32 %v810_v24, %v2953_v40  ;;  %v2956_v44 = vpop.f32.mrb[37].mxu0 }
 0x2b5   : > { %v849_v46 = vmax.f32 %v847_v26, %v2956_v44  ;;  %v2959_v48 = vpop.f32.mrb[38].mxu0 }
 0x2b6   : > { %v813_v50 = vmax.f32 %v811_v34, %v2959_v48  ;;  %v2962_v52 = vpop.f32.mrb[39].mxu0 }
 0x2b7   : > { %3606 = vst [vmem:[#allocation38_spill] sm:$0xff] %v2962_v52  ;;  %v850_v54 = vmax.f32 %v848_v38, %v2962_v52 }
 0x2bb   : > { %v2965_v56 = vpop.f32.mrb[40].mxu0 }
 0x2bc   : > { %3607 = vst [vmem:[#allocation39_spill] sm:$0xff] %v2965_v56  ;;  %v814_v58 = vmax.f32 %v812_v42, %v2965_v56  ;;  %v2968_v60 = vpop.f32.mrb[41].mxu0 }
 0x2bd   : > { %3608 = vst [vmem:[#allocation40_spill] sm:$0xff] %v2968_v60  ;;  %v851_v62 = vmax.f32 %v849_v46, %v2968_v60  ;;  %v2971_v0 = vpop.f32.mrb[42].mxu0 }
 0x2be   : > { %3609 = vst [vmem:[#allocation41_spill] sm:$0xff] %v2971_v0  ;;  %v815_v2 = vmax.f32 %v813_v50, %v2971_v0  ;;  %v2974_v4 = vpop.f32.mrb[43].mxu0 }
 0x2bf   : > { %3610 = vst [vmem:[#allocation42_spill] sm:$0xff] %v2974_v4  ;;  %v852_v6 = vmax.f32 %v850_v54, %v2974_v4 }
 0x2c3   : > { %v2977_v8 = vpop.f32.mrb[44].mxu0 }
 0x2c4   : > { %3611 = vst [vmem:[#allocation43_spill] sm:$0xff] %v2977_v8  ;;  %v816_v10 = vmax.f32 %v814_v58, %v2977_v8  ;;  %v2980_v12 = vpop.f32.mrb[45].mxu0 }
 0x2c5   : > { %3612 = vst [vmem:[#allocation44_spill] sm:$0xff] %v2980_v12  ;;  %v853_v14 = vmax.f32 %v851_v62, %v2980_v12  ;;  %v2983_v16 = vpop.f32.mrb[46].mxu0 }
 0x2c6   : > { %3613 = vst [vmem:[#allocation45_spill] sm:$0xff] %v2983_v16  ;;  %v817_v18 = vmax.f32 %v815_v2, %v2983_v16  ;;  %v2986_v20 = vpop.f32.mrb[47].mxu0  ;;  %v876_v16 = vlaneseq }
 0x2c7   : > { %3614 = vst [vmem:[#allocation46_spill] sm:$0xff] %v2986_v20  ;;  %v854_v22 = vmax.f32 %v852_v6, %v2986_v20 }
 0x2c8   : > { %v877_v56 = vshrl.u32 %v876_v16, 7  ;;  %vm1209_vm3 = vcmp.lt.s32.totalorder %v876_v16, 256 }
 0x2cb   : > { %v2989_v24 = vpop.f32.mrb[48].mxu0 }
 0x2cc   : > { %3615 = vst [vmem:[#allocation47_spill] sm:$0xff] %v2989_v24  ;;  %v818_v26 = vmax.f32 %v816_v10, %v2989_v24  ;;  %v2992_v34 = vpop.f32.mrb[49].mxu0 }
 0x2cd   : > { %3616 = vst [vmem:[#allocation48_spill] sm:$0xff] %v2992_v34  ;;  %v855_v38 = vmax.f32 %v853_v14, %v2992_v34  ;;  %v2995_v42 = vpop.f32.mrb[50].mxu0 }
 0x2ce   : > { %3617 = vst [vmem:[#allocation49_spill] sm:$0xff] %v2995_v42  ;;  %v819_v46 = vmax.f32 %v817_v18, %v2995_v42  ;;  %v2998_v50 = vpop.f32.mrb[51].mxu0 }
 0x2cf   : > { %3618 = vst [vmem:[#allocation50_spill] sm:$0xff] %v2998_v50  ;;  %v856_v54 = vmax.f32 %v854_v22, %v2998_v50 }
 0x2d3   : > { %v3001_v58 = vpop.f32.mrb[52].mxu0 }
 0x2d4   : > { %3619 = vst [vmem:[#allocation51_spill] sm:$0xff] %v3001_v58  ;;  %v820_v62 = vmax.f32 %v818_v26, %v3001_v58  ;;  %v3004_v2 = vpop.f32.mrb[53].mxu0 }
 0x2d5   : > { %3620 = vst [vmem:[#allocation52_spill] sm:$0xff] %v3004_v2  ;;  %v857_v6 = vmax.f32 %v855_v38, %v3004_v2  ;;  %v3007_v10 = vpop.f32.mrb[54].mxu0 }
 0x2d6   : > { %3621 = vst [vmem:[#allocation53_spill] sm:$0xff] %v3007_v10  ;;  %v821_v14 = vmax.f32 %v819_v46, %v3007_v10  ;;  %v3010_v34 = vpop.f32.mrb[55].mxu0 }
 0x2d7   : > { %3622 = vst [vmem:[#allocation54_spill] sm:$0xff] %v3010_v34  ;;  %v858_v18 = vmax.f32 %v856_v54, %v3010_v34 }
 0x2db   : > { %v3013_v42 = vpop.f32.mrb[56].mxu0 }
 0x2dc   : > { %3623 = vst [vmem:[#allocation55_spill] sm:$0xff] %v3013_v42  ;;  %v822_v22 = vmax.f32 %v820_v62, %v3013_v42  ;;  %v3016_v50 = vpop.f32.mrb[57].mxu0 }
 0x2dd   : > { %3624 = vst [vmem:[#allocation56_spill] sm:$0xff] %v3016_v50  ;;  %v859_v26 = vmax.f32 %v857_v6, %v3016_v50  ;;  %v3019_v58 = vpop.f32.mrb[58].mxu0 }
 0x2de   : > { %3625 = vst [vmem:[#allocation57_spill] sm:$0xff] %v3019_v58  ;;  %v823_v38 = vmax.f32 %v821_v14, %v3019_v58  ;;  %v3022_v2 = vpop.f32.mrb[59].mxu0 }
 0x2df   : > { %3626 = vst [vmem:[#allocation58_spill] sm:$0xff] %v3022_v2  ;;  %v860_v46 = vmax.f32 %v858_v18, %v3022_v2  ;;  %v1816_v18 = vld [vmem:[%s3037_s11 + $0x4] ss:$16 sps:$4 sm:$0x1f]  }
 0x2e0   : > { %1188 = vmatprep.mubr.bf16.mxu1 %v1816_v18 }
 0x2e3   : > { %v3025_v10 = vpop.f32.mrb[60].mxu0 }
 0x2e4   : > { %3627 = vst [vmem:[#allocation59_spill] sm:$0xff] %v3025_v10  ;;  %v824_v54 = vmax.f32 %v822_v22, %v3025_v10  ;;  %v3028_v34 = vpop.f32.mrb[61].mxu0 }
 0x2e5   : > { %3628 = vst [vmem:[#allocation60_spill] sm:$0xff] %v3028_v34  ;;  %v861_v62 = vmax.f32 %v859_v26, %v3028_v34  ;;  %v3031_v42 = vpop.f32.mrb[62].mxu0  ;;  %v2328_v26 = vmov 1966171168  }
 0x2e6   : > { %3629 = vst [vmem:[#allocation61_spill] sm:$0xff] %v3031_v42  ;;  %v825_v6 = vmax.f32 %v823_v38, %v3031_v42  ;;  %v792_v14 = vpop.f32.mrb[63].mxu0  ;;  %v874_v34 = vunpack.c.l.s4 %v2328_v26  ;;  %v3640_v26 = vld [vmem:[#allocation44_spill] sm:$0xff] }
 0x2e7   : > { %v862_v58 = vmax.f32 %v860_v46, %v792_v14 }
 0x2e8   : > { %v826_v2 = vmax.f32 %v824_v54, %v825_v6  ;;  %v875_v60 = vunpack.c.0.s8 %v874_v34  ;;  %v3041_v6 = vld [vmem:[#allocation2] sm:$0x3] }
 0x2e9   : > { %v863_v50 = vmax.f32 %v861_v62, %v862_v58  ;;  %3630 = vst [vmem:[#allocation62_spill] sm:$0xff] %v3041_v6 }
 0x2ea   : > { %v827_v22 = vrot.slane %v826_v2, 4  ;;  %v878_v54 = vsub.s32 %v875_v60, %v877_v56 }
 0x2eb   : > { %v864_v10 = vrot.slane %v863_v50, 4 }
 0x2ec   : > { %v828_v24 = vmax.f32 %v826_v2, %v827_v22  ;;  %v3656_v22 = vld [vmem:[#allocation60_spill] sm:$0xff] }
 0x2ed   : > { %v865_v20 = vmax.f32 %v863_v50, %v864_v10  ;;  %v3043_v50 = vsub.s32 0, %v877_v56  ;;  %v3045_v10 = vsub.s32 1, %v877_v56 }
 0x2ee   : > { %v829_v12 = vrot.slane %v828_v24, 2 }
 0x2ef   : > { %v866_v8 = vrot.slane %v865_v20, 2  ;;  %3631 = vst [vmem:[#allocation63_spill] sm:$0xff] %v3043_v50  ;;  %3632 = vst [vmem:[#allocation64_spill] sm:$0xff] %v3045_v10 }
 0x2f0   : > { %v830_v4 = vmax.f32 %v828_v24, %v829_v12 }
 0x2f1   : > { %v867_v0 = vmax.f32 %v865_v20, %v866_v8 }
 0x2f2   : > { %v831_v38 = vrot.slane %v830_v4, 1 }
 0x2f3   : > { %v868_v42 = vrot.slane %v867_v0, 1 }
 0x2f4   : > { %v832_v46 = vmax.f32 %v830_v4, %v831_v38  ;;  %v3634_v38 = vld [vmem:[#allocation38_spill] sm:$0xff] }
 0x2f5   : > { %v869_v52 = vmax.f32 %v867_v0, %v868_v42 }
 0x2f7   : > { %v872_v58 = vcombine.low %v832_v46, %v869_v52  ;;  %v3635_v46 = vld [vmem:[#allocation39_spill] sm:$0xff] }
 0x2f8   : > { %v3639_v52 = vld [vmem:[#allocation43_spill] sm:$0xff] }
 0x2f9   : > { %v879_v62 = vrot.slane %v872_v58, %v878_v54 }
 0x2fb   : > { %v886_v2 = vrot.slane %v879_v62, %v878_v54  ;;  %v3637_v62 = vld [vmem:[#allocation41_spill] sm:$0xff] }
 0x2fc   : > { %v3641_v54 = vld [vmem:[#allocation45_spill] sm:$0xff] }
 0x2fd   : > { %v3048_v12 = vmax.f32 %v3041_v6, %v886_v2  ;;  %v3638_v2 = vld [vmem:[#allocation42_spill] sm:$0xff]  ;;  %v3655_v6 = vld [vmem:[#allocation59_spill] sm:$0xff] }
 0x2ff   : > { %3633 = vst [vmem:[#allocation65_spill] sm:$0xff] %v3048_v12  ;;  %v3052_v8 = vrot.slane %v3048_v12, %v3043_v50  ;;  %v3056_v60 = vrot.slane %v3048_v12, %v3045_v10  ;;  %1211 = vst.msk [vmem:[#allocation2] sm:$0x3] %vm1209_vm3, %v3048_v12  ;;  %v3652_v10 = vld [vmem:[#allocation56_spill] sm:$0xff]  ;;  %v3653_v50 = vld [vmem:[#allocation57_spill] sm:$0xff] }
 0x301   : > { %v966_v56 = vsub.f32 %v792_v14, %v3056_v60  ;;  %v3658_v14 = vsub.f32 %v2845_v27, %v3052_v8  ;;  %v3659_v42 = vsub.f32 %v2847_v28, %v3056_v60  ;;  %v3660_v24 = vsub.f32 %v2849_v29, %v3052_v8 }
 0x302   : > { %v3661_v20 = vsub.f32 %v2851_v30, %v3056_v60  ;;  %v3662_v4 = vsub.f32 %v2853_v31, %v3052_v8  ;;  %v3663_v27 = vsub.f32 %v2857_v33, %v3056_v60  ;;  %v3665_v30 = vsub.f32 %v2865_v37, %v3056_v60 }
 0x303   : > { %v1093_v58 = vmul.f32 1.442695, %v966_v56  ;;  %v3636_v56 = vld [vmem:[#allocation40_spill] sm:$0xff]  ;;  %v967_v0 = vmul.f32 1.442695, %v3658_v14  ;;  %v3666_v31 = vsub.f32 %v2869_v39, %v3052_v8  ;;  %v3667_v33 = vsub.f32 %v2872_v41, %v3056_v60 }
 0x304   : > { %v969_v34 = vmul.f32 1.442695, %v3659_v42  ;;  %v971_v12 = vmul.f32 1.442695, %v3660_v24  ;;  %v973_v16 = vmul.f32 1.442695, %v3661_v20  ;;  %v3664_v42 = vsub.f32 %v2861_v35, %v3052_v8 }
 0x305   : > { %1817 = vpow2.f32 %v1093_v58  ;;  %v975_v18 = vmul.f32 1.442695, %v3662_v4  ;;  %v977_v28 = vmul.f32 1.442695, %v3663_v27  ;;  %v981_v20 = vmul.f32 1.442695, %v3665_v30 }
 0x306   : > { %1819 = vpow2.f32 %v967_v0  ;;  %v979_v29 = vmul.f32 1.442695, %v3664_v42  ;;  %v983_v0 = vmul.f32 1.442695, %v3666_v31  ;;  %v985_v4 = vmul.f32 1.442695, %v3667_v33 }
 0x307   : > { %1821 = vpow2.f32 %v969_v34  ;;  %v3668_v35 = vsub.f32 %v2875_v43, %v3052_v8  ;;  %v3669_v37 = vsub.f32 %v2878_v45, %v3056_v60  ;;  %v3670_v39 = vsub.f32 %v2881_v47, %v3052_v8 }
 0x308   : > { %1823 = vpow2.f32 %v971_v12  ;;  %v3671_v41 = vsub.f32 %v2884_v49, %v3056_v60  ;;  %v3672_v43 = vsub.f32 %v2887_v51, %v3052_v8  ;;  %v3673_v27 = vsub.f32 %v2890_v53, %v3056_v60 }
 0x309   : > { %1825 = vpow2.f32 %v973_v16  ;;  %v987_v12 = vmul.f32 1.442695, %v3668_v35  ;;  %v989_v16 = vmul.f32 1.442695, %v3669_v37  ;;  %v991_v24 = vmul.f32 1.442695, %v3670_v39 }
 0x30a   : > { %1827 = vpow2.f32 %v975_v18  ;;  %v993_v14 = vmul.f32 1.442695, %v3671_v41  ;;  %v995_v58 = vmul.f32 1.442695, %v3672_v43  ;;  %v997_v47 = vmul.f32 1.442695, %v3673_v27 }
 0x30b   : > { %1829 = vpow2.f32 %v977_v28  ;;  %v3674_v42 = vsub.f32 %v2893_v55, %v3052_v8  ;;  %v3675_v30 = vsub.f32 %v2896_v57, %v3056_v60  ;;  %v3676_v31 = vsub.f32 %v2899_v59, %v3052_v8 }
 0x30c   : > { %1831 = vpow2.f32 %v979_v29  ;;  %v3677_v33 = vsub.f32 %v2902_v61, %v3056_v60  ;;  %v3678_v35 = vsub.f32 %v2905_v63, %v3052_v8  ;;  %v3679_v37 = vsub.f32 %v2908_v1, %v3056_v60 }
 0x30d   : > { %1833 = vpow2.f32 %v981_v20  ;;  %v999_v29 = vmul.f32 1.442695, %v3674_v42  ;;  %v1001_v20 = vmul.f32 1.442695, %v3675_v30  ;;  %v3680_v39 = vsub.f32 %v2911_v3, %v3052_v8 }
 0x30e   : > { %1835 = vpow2.f32 %v983_v0  ;;  %v1003_v0 = vmul.f32 1.442695, %v3676_v31  ;;  %v3681_v41 = vsub.f32 %v2914_v5, %v3056_v60  ;;  %v3682_v1 = vsub.f32 %v2917_v7, %v3052_v8 }
 0x30f   : > { %v3227_v34 = vpop.eup %1817  ;;  %1837 = vpow2.f32 %v985_v4  ;;  %v1005_v4 = vmul.f32 1.442695, %v3677_v33  ;;  %v3683_v3 = vsub.f32 %v2920_v9, %v3056_v60  ;;  %v3686_v9 = vsub.f32 %v2929_v15, %v3052_v8 }
 0x310   : > { %v1820_v18 = vpop.eup %1819  ;;  %1839 = vpow2.f32 %v987_v12  ;;  %v1007_v12 = vmul.f32 1.442695, %v3678_v35  ;;  %v1015_v27 = vmul.f32 1.442695, %v3682_v1  ;;  %v3689_v15 = vsub.f32 %v2938_v21, %v3056_v60 }
 0x311   : > { %v1822_v45 = vpop.eup %1821  ;;  %1841 = vpow2.f32 %v989_v16  ;;  %v1009_v16 = vmul.f32 1.442695, %v3679_v37  ;;  %v1017_v30 = vmul.f32 1.442695, %v3683_v3  ;;  %v3692_v21 = vsub.f32 %v2947_v32, %v3052_v8 }
 0x312   : > { %v1824_v28 = vpop.eup %1823  ;;  %1843 = vpow2.f32 %v991_v24  ;;  %v1011_v24 = vmul.f32 1.442695, %v3680_v39  ;;  %v1029_v37 = vmul.f32 1.442695, %v3689_v15  ;;  %v3695_v32 = vsub.f32 %v2956_v44, %v3056_v60 }
 0x313   : > { %v1826_v49 = vpop.eup %1825  ;;  %1845 = vpow2.f32 %v993_v14  ;;  %v1013_v14 = vmul.f32 1.442695, %v3681_v41  ;;  %v1095_v43 = vpack.c.bf16 %v1824_v28, %v1820_v18  ;;  %v3684_v18 = vsub.f32 %v2923_v11, %v3052_v8 }
 0x314   : > { %v1828_v51 = vpop.eup %1827  ;;  %1847 = vpow2.f32 %v995_v58  ;;  %v1096_v63 = vpack.c.bf16 %v1826_v49, %v1822_v45  ;;  %v3685_v49 = vsub.f32 %v2926_v13, %v3056_v60  ;;  %v3687_v11 = vsub.f32 %v2932_v17, %v3056_v60 }
 0x315   : > { %v1830_v53 = vpop.eup %1829  ;;  %1849 = vpow2.f32 %v997_v47  ;;  %v1019_v45 = vmul.f32 1.442695, %v3684_v18  ;;  %v3688_v13 = vsub.f32 %v2935_v19, %v3052_v8  ;;  %v3690_v17 = vsub.f32 %v2941_v23, %v3052_v8 }
 0x316   : > { %v1832_v55 = vpop.eup %1831  ;;  %1851 = vpow2.f32 %v999_v29  ;;  %1156 = vmatprep.subr.bf16.mxu1 %v1096_v63  ;;  %v1025_v33 = vmul.f32 1.442695, %v3687_v11  ;;  %v3691_v19 = vsub.f32 %v2944_v25, %v3056_v60  ;;  %v3693_v23 = vsub.f32 %v2950_v36, %v3056_v60 }
 0x317   : > { %v1834_v57 = vpop.eup %1833  ;;  %1853 = vpow2.f32 %v1001_v20  ;;  %v1097_v42 = vpack.c.bf16 %v1832_v55, %v1828_v51  ;;  %1157 = vmatpush1.bf16.msra.mxu1 %v1095_v43  ;;  %v1021_v51 = vmul.f32 1.442695, %v3685_v49  ;;  %v1027_v35 = vmul.f32 1.442695, %v3688_v13 }
 0x318   : > { %v1836_v59 = vpop.eup %1835  ;;  %1855 = vpow2.f32 %v1003_v0  ;;  %v1098_v47 = vpack.c.bf16 %v1834_v57, %v1830_v53  ;;  %v1023_v0 = vmul.f32 1.442695, %v3686_v9  ;;  %v3694_v25 = vsub.f32 %v2953_v40, %v3052_v8 }
 0x319   : > { %v1838_v61 = vpop.eup %1837  ;;  %1857 = vpow2.f32 %v1005_v4  ;;  %v3696_v36 = vsub.f32 %v2959_v48, %v3052_v8  ;;  %v3697_v40 = vsub.f32 %v3634_v38, %v3056_v60  ;;  %v3698_v44 = vsub.f32 %v3635_v46, %v3052_v8 }
 0x31a   : > { %v1840_v58 = vpop.eup %1839  ;;  %1859 = vpow2.f32 %v1007_v12  ;;  %1158 = vmatprep.subr.bf16.mxu1 %v1098_v47  ;;  %v3699_v48 = vsub.f32 %v3636_v56, %v3056_v60  ;;  %v3700_v38 = vsub.f32 %v3637_v62, %v3052_v8  ;;  %v3701_v46 = vsub.f32 %v3638_v2, %v3056_v60 }
 0x31b   : > { %v1842_v29 = vpop.eup %1841  ;;  %1861 = vpow2.f32 %v1009_v16  ;;  %v1099_v20 = vpack.c.bf16 %v1840_v58, %v1836_v59  ;;  %1159 = vmatpush1.bf16.msra.mxu1 %v1097_v42  ;;  %v1031_v59 = vmul.f32 1.442695, %v3690_v17  ;;  %v1037_v58 = vmul.f32 1.442695, %v3693_v23 }
 0x31c   : > { %v1844_v5 = vpop.eup %1843  ;;  %1863 = vpow2.f32 %v1011_v24  ;;  %v1100_v28 = vpack.c.bf16 %v1842_v29, %v1838_v61  ;;  %v1033_v24 = vmul.f32 1.442695, %v3691_v19  ;;  %v1041_v42 = vmul.f32 1.442695, %v3695_v32 }
 0x31d   : > { %v1846_v7 = vpop.eup %1845  ;;  %1865 = vpow2.f32 %v1013_v14  ;;  %v1035_v14 = vmul.f32 1.442695, %v3692_v21  ;;  %v1045_v18 = vmul.f32 1.442695, %v3697_v40  ;;  %v1049_v49 = vmul.f32 1.442695, %v3699_v48 }
 0x31e   : > { %v1848_v31 = vpop.eup %1847  ;;  %1867 = vpow2.f32 %v1015_v27  ;;  %1160 = vmatprep.subr.bf16.mxu1 %v1100_v28  ;;  %v1039_v27 = vmul.f32 1.442695, %v3694_v25  ;;  %v1047_v28 = vmul.f32 1.442695, %v3698_v44  ;;  %v1051_v9 = vmul.f32 1.442695, %v3700_v38 }
 0x31f   : > { %v1850_v53 = vpop.eup %1849  ;;  %1869 = vpow2.f32 %v1017_v30  ;;  %v1101_v4 = vpack.c.bf16 %v1848_v31, %v1844_v5  ;;  %1161 = vmatpush1.bf16.msra.mxu1 %v1099_v20  ;;  %v1043_v30 = vmul.f32 1.442695, %v3696_v36  ;;  %v1053_v11 = vmul.f32 1.442695, %v3701_v46  ;;  %v3713_v25 = vld [vmem:[#allocation50_spill] sm:$0xff] }
 0x320   : > { %v1852_v55 = vpop.eup %1851  ;;  %1871 = vpow2.f32 %v1019_v45  ;;  %v1102_v12 = vpack.c.bf16 %v1850_v53, %v1846_v7  ;;  %v3702_v56 = vsub.f32 %v3639_v52, %v3052_v8  ;;  %v3703_v62 = vsub.f32 %v3640_v26, %v3056_v60  ;;  %v3707_v26 = vld [vmem:[#allocation47_spill] sm:$0xff] }
 0x321   : > { %v1854_v57 = vpop.eup %1853  ;;  %1873 = vpow2.f32 %v1021_v51  ;;  %v3704_v2 = vsub.f32 %v3641_v54, %v3052_v8 }
 0x322   : > { %v1856_v16 = vpop.eup %1855  ;;  %1875 = vpow2.f32 %v1023_v0  ;;  %1162 = vmatprep.subr.bf16.mxu1 %v1102_v12  ;;  %v1057_v13 = vmul.f32 1.442695, %v3703_v62 }
 0x323   : > { %v1858_v39 = vpop.eup %1857  ;;  %1877 = vpow2.f32 %v1025_v33  ;;  %v1103_v61 = vpack.c.bf16 %v1856_v16, %v1852_v55  ;;  %1163 = vmatpush1.bf16.msra.mxu1 %v1101_v4  ;;  %v1055_v4 = vmul.f32 1.442695, %v3702_v56  ;;  %v3705_v16 = vld [vmem:[#allocation46_spill] sm:$0xff] }
 0x324   : > { %v1860_v41 = vpop.eup %1859  ;;  %1879 = vpow2.f32 %v1027_v35  ;;  %v1104_v63 = vpack.c.bf16 %v1858_v39, %v1854_v57  ;;  %v1059_v57 = vmul.f32 1.442695, %v3704_v2  ;;  %v3706_v52 = vsub.f32 %v3705_v16, %v3056_v60 }
 0x325   : > { %v1862_v43 = vpop.eup %1861  ;;  %1881 = vpow2.f32 %v1029_v37  ;;  %v3708_v39 = vsub.f32 %v3707_v26, %v3052_v8  ;;  %v3731_v26 = vld [vmem:[#allocation61_spill] sm:$0xff] }
 0x326   : > { %v1864_v1 = vpop.eup %1863  ;;  %1883 = vpow2.f32 %v1031_v59  ;;  %1164 = vmatprep.subr.bf16.mxu1 %v1104_v63  ;;  %v1061_v17 = vmul.f32 1.442695, %v3706_v52  ;;  %v3711_v63 = vld [vmem:[#allocation49_spill] sm:$0xff] }
 0x327   : > { %v1866_v47 = vpop.eup %1865  ;;  %1885 = vpow2.f32 %v1033_v24  ;;  %v1105_v29 = vpack.c.bf16 %v1864_v1, %v1860_v41  ;;  %1165 = vmatpush1.bf16.msra.mxu1 %v1103_v61  ;;  %v1063_v19 = vmul.f32 1.442695, %v3708_v39  ;;  %v3709_v61 = vld [vmem:[#allocation48_spill] sm:$0xff]  ;;  %v3732_v39 = vsub.f32 %v3731_v26, %v3052_v8 }
 0x328   : > { %v1868_v3 = vpop.eup %1867  ;;  %1887 = vpow2.f32 %v1035_v14  ;;  %v1106_v20 = vpack.c.bf16 %v1866_v47, %v1862_v43  ;;  %v3710_v54 = vsub.f32 %v3709_v61, %v3056_v60  ;;  %v3712_v43 = vsub.f32 %v3711_v63, %v3052_v8 }
 0x329   : > { %v1870_v5 = vpop.eup %1869  ;;  %1889 = vpow2.f32 %v1037_v58 }
 0x32a   : > { %v1872_v45 = vpop.eup %1871  ;;  %1891 = vpow2.f32 %v1039_v27  ;;  %1166 = vmatprep.subr.bf16.mxu1 %v1106_v20  ;;  %v1065_v41 = vmul.f32 1.442695, %v3710_v54  ;;  %v1067_v23 = vmul.f32 1.442695, %v3712_v43  ;;  %v3714_v27 = vsub.f32 %v3713_v25, %v3056_v60 }
 0x32b   : > { %v1874_v7 = vpop.eup %1873  ;;  %1893 = vpow2.f32 %v1041_v42  ;;  %v1107_v51 = vpack.c.bf16 %v1872_v45, %v1868_v3  ;;  %1167 = vmatpush1.bf16.msra.mxu1 %v1105_v29  ;;  %v3715_v42 = vld [vmem:[#allocation51_spill] sm:$0xff]  ;;  %v3719_v45 = vld [vmem:[#allocation53_spill] sm:$0xff] }
 0x32c   : > { %v1876_v31 = vpop.eup %1875  ;;  %1895 = vpow2.f32 %v1043_v30  ;;  %v1108_v0 = vpack.c.bf16 %v1874_v7, %v1870_v5  ;;  %v1069_v47 = vmul.f32 1.442695, %v3714_v27  ;;  %v3716_v29 = vsub.f32 %v3715_v42, %v3052_v8  ;;  %v3717_v30 = vld [vmem:[#allocation52_spill] sm:$0xff] }
 0x32d   : > { %v1878_v53 = vpop.eup %1877  ;;  %1897 = vpow2.f32 %v1045_v18  ;;  %v3718_v20 = vsub.f32 %v3717_v30, %v3056_v60  ;;  %v3720_v44 = vsub.f32 %v3719_v45, %v3052_v8  ;;  %v1814_v30 = vld [vmem:[%s3037_s11] ss:$16 sps:$4 sm:$0x1f]  }
 0x32e   : > { %v1880_v33 = vpop.eup %1879  ;;  %1899 = vpow2.f32 %v1047_v28  ;;  %1168 = vmatprep.subr.bf16.mxu1 %v1108_v0  ;;  %v1071_v3 = vmul.f32 1.442695, %v3716_v29 }
 0x32f   : > { %v1882_v55 = vpop.eup %1881  ;;  %1901 = vpow2.f32 %v1049_v49  ;;  %v1109_v35 = vpack.c.bf16 %v1880_v33, %v1876_v31  ;;  %1169 = vmatpush1.bf16.msra.mxu1 %v1107_v51  ;;  %v1073_v5 = vmul.f32 1.442695, %v3718_v20  ;;  %v1075_v28 = vmul.f32 1.442695, %v3720_v44  ;;  %v3721_v49 = vld [vmem:[#allocation54_spill] sm:$0xff]  ;;  %v3736_v44 = vld [vmem:[#allocation63_spill] sm:$0xff] }
 0x330   : > { %v1884_v12 = vpop.eup %1883  ;;  %1903 = vpow2.f32 %v1051_v9  ;;  %v1110_v15 = vpack.c.bf16 %v1882_v55, %v1878_v53  ;;  %v3722_v51 = vsub.f32 %v3721_v49, %v3056_v60  ;;  %v3723_v9 = vld [vmem:[#allocation55_spill] sm:$0xff]  ;;  %v3726_v55 = vsub.f32 %v3653_v50, %v3052_v8  ;;  %v3733_v20 = vld [vmem:[#allocation62_spill] sm:$0xff] }
 0x331   : > { %v1886_v37 = vpop.eup %1885  ;;  %1905 = vpow2.f32 %v1053_v11  ;;  %v3724_v0 = vsub.f32 %v3723_v9, %v3052_v8  ;;  %v3725_v11 = vsub.f32 %v3652_v10, %v3056_v60  ;;  %v3729_v10 = vsub.f32 %v3655_v6, %v3052_v8 }
 0x332   : > { %v1888_v59 = vpop.eup %1887  ;;  %1907 = vpow2.f32 %v1055_v4  ;;  %1170 = vmatprep.subr.bf16.mxu1 %v1110_v15  ;;  %v1077_v31 = vmul.f32 1.442695, %v3722_v51  ;;  %v1083_v62 = vmul.f32 1.442695, %v3726_v55  ;;  %v3730_v50 = vsub.f32 %v3656_v22, %v3056_v60  ;;  %v1129_v51 = vld [vmem:[#allocation3 + $0x10] sm:$0x1] }
 0x333   : > { %v1890_v24 = vpop.eup %1889  ;;  %1909 = vpow2.f32 %v1057_v13  ;;  %v1111_v21 = vpack.c.bf16 %v1888_v59, %v1884_v12  ;;  %1171 = vmatpush1.bf16.msra.mxu1 %v1109_v35  ;;  %v1079_v53 = vmul.f32 1.442695, %v3724_v0  ;;  %v1081_v33 = vmul.f32 1.442695, %v3725_v11  ;;  %v3727_v12 = vld [vmem:[#allocation58_spill] sm:$0xff] }
 0x334   : > { %v1892_v14 = vpop.eup %1891  ;;  %1911 = vpow2.f32 %v1059_v57  ;;  %v1112_v58 = vpack.c.bf16 %v1890_v24, %v1886_v37  ;;  %v3728_v2 = vsub.f32 %v3727_v12, %v3056_v60  ;;  %v1087_v37 = vmul.f32 1.442695, %v3729_v10  ;;  %v1344_v10 = vld [vmem:[#allocation15] sm:$0xff] (!%p1624_p1) }
 0x335   : > { %v1894_v1 = vpop.eup %1893  ;;  %1913 = vpow2.f32 %v1061_v17  ;;  %v1089_v52 = vmul.f32 1.442695, %v3730_v50 }
 0x336   : > { %v1896_v32 = vpop.eup %1895  ;;  %1915 = vpow2.f32 %v1063_v19  ;;  %1172 = vmatprep.subr.bf16.mxu1 %v1112_v58  ;;  %v1085_v57 = vmul.f32 1.442695, %v3728_v2  ;;  %v1091_v19 = vmul.f32 1.442695, %v3732_v39  ;;  %v3739_v39 = vld [vmem:[#allocation63_spill] sm:$0xff] (!%p1624_p1) }
 0x337   : > { %v1898_v36 = vpop.eup %1897  ;;  %1917 = vpow2.f32 %v1065_v41  ;;  %v1113_v40 = vpack.c.bf16 %v1896_v32, %v1892_v14  ;;  %1173 = vmatpush1.bf16.msra.mxu1 %v1111_v21 }
 0x338   : > { %v1900_v18 = vpop.eup %1899  ;;  %1919 = vpow2.f32 %v1067_v23  ;;  %v1114_v7 = vpack.c.bf16 %v1898_v36, %v1894_v1 }
 0x339   : > { %v1902_v48 = vpop.eup %1901  ;;  %1921 = vpow2.f32 %v1069_v47 }
 0x33a   : > { %v1904_v38 = vpop.eup %1903  ;;  %1923 = vpow2.f32 %v1071_v3  ;;  %1174 = vmatprep.subr.bf16.mxu1 %v1114_v7  ;;  %v1127_v7 = vld [vmem:[#allocation3] sm:$0xff] }
 0x33b   : > { %v1906_v46 = vpop.eup %1905  ;;  %1925 = vpow2.f32 %v1073_v5  ;;  %v1115_v56 = vpack.c.bf16 %v1904_v38, %v1900_v18  ;;  %1175 = vmatpush1.bf16.msra.mxu1 %v1113_v40  ;;  %v3734_v5 = vld [vmem:[#allocation65_spill] sm:$0xff]  ;;  %v1130_v38 = vld [vmem:[#allocation3 + $0x18] sm:$0x1] }
 0x33c   : > { %v1908_v4 = vpop.eup %1907  ;;  %1927 = vpow2.f32 %v1075_v28  ;;  %v1116_v13 = vpack.c.bf16 %v1906_v46, %v1902_v48  ;;  %v3735_v40 = vsub.f32 %v3733_v20, %v3734_v5  ;;  %v3737_v48 = vld [vmem:[#allocation64_spill] sm:$0xff] }
 0x33d   : > { %v1910_v35 = vpop.eup %1909  ;;  %1929 = vpow2.f32 %v1077_v31 }
 0x33e   : > { %v1912_v15 = vpop.eup %1911  ;;  %1931 = vpow2.f32 %v1079_v53  ;;  %1176 = vmatprep.subr.bf16.mxu1 %v1116_v13  ;;  %v890_v18 = vmul.f32 1.442695, %v3735_v40 }
 0x33f   : > { %v1914_v16 = vpop.eup %1913  ;;  %1933 = vpow2.f32 %v1081_v33  ;;  %v1117_v17 = vpack.c.bf16 %v1912_v15, %v1908_v4  ;;  %1177 = vmatpush1.bf16.msra.mxu1 %v1115_v56  ;;  %v2329_v15 = vmov (!%p1624_p1), 0  }
 0x340   : > { %v1916_v59 = vpop.eup %1915  ;;  %1935 = vpow2.f32 %v1083_v62  ;;  %v1118_v24 = vpack.c.bf16 %v1914_v16, %v1910_v35  ;;  %v1238_v35 = vld [vmem:[%s2785_s19] sm:$0xff] (!%p1624_p1)  ;;  %1285 = vmatprep.mubr.bf16.mxu0 (!%p1624_p1), %v2329_v15  ;;  %1947 = vset.pattern.permute.xlu0 (!%p1624_p1), %v2329_v15  ;;  %v1237_v16 = vld [vmem:[#allocation13] sm:$0xf] (!%p1624_p1) }
 0x341   : > { %v1918_v61 = vpop.eup %1917  ;;  %1937 = vpow2.f32 %v1085_v57  ;;  %v1626_v2 = vcombine.high (!%p1624_p1), %v1238_v35, %v1238_v35  ;;  %v1625_v57 = vcombine.low (!%p1624_p1), %v1238_v35, %v1238_v35  ;;  %1347 = vperm.xlu0 (!%p1624_p1), %1947, %v1344_v10  }
 0x342   : > { %v1920_v6 = vpop.eup %1919  ;;  %1939 = vpow2.f32 %v1087_v37  ;;  %1178 = vmatprep.subr.bf16.mxu1 %v1118_v24 }
 0x343   : > { %v1922_v54 = vpop.eup %1921  ;;  %1941 = vpow2.f32 %v1089_v52  ;;  %v1119_v41 = vpack.c.bf16 %v1920_v6, %v1916_v59  ;;  %1179 = vmatpush1.bf16.msra.mxu1 %v1117_v17  ;;  %1627 = vmatprep.subr.msk.bf16.mxu0 (!%p1624_p1), %vm595_vm1, %v1626_v2  ;;  %v1248_v37 = vsel (!%p1624_p1), %vm595_vm1, %v1625_v57, 0  ;;  %v3738_v59 = vld [vmem:[#allocation64_spill] sm:$0xff] (!%p1624_p1) }
 0x344   : > { %v1924_v21 = vpop.eup %1923  ;;  %1943 = vpow2.f32 %v1091_v19  ;;  %v1120_v60 = vpack.c.bf16 %v1922_v54, %v1918_v61  ;;  %1254 = vmatpush1.bf16.msra.mxu0 (!%p1624_p1), %v1248_v37 }
 0x345   : > { %v1926_v22 = vpop.eup %1925  ;;  %1945 = vpow2.f32 %v890_v18 }
 0x346   : > { %v1928_v14 = vpop.eup %1927  ;;  %1180 = vmatprep.subr.bf16.mxu1 %v1120_v60 }
 0x347   : > { %v1930_v63 = vpop.eup %1929  ;;  %v1121_v8 = vpack.c.bf16 %v1928_v14, %v1924_v21  ;;  %1181 = vmatpush1.bf16.msra.mxu1 %v1119_v41  ;;  %1628 = vmatmul.mubr.msk.bf16.vlgmr.msra.gmra.mrb[0].mxu0 (!%p1624_p1), %vm546_vm2, %v1237_v16  ;;  %v1234_v21 = vld [vmem:[#allocation12] sm:$0xf] (!%p1624_p1) }
 0x348   : > { %v1932_v43 = vpop.eup %1931  ;;  %v1122_v23 = vpack.c.bf16 %v1930_v63, %v1926_v22 }
 0x349   : > { %v1934_v58 = vpop.eup %1933 }
 0x34a   : > { %v1936_v1 = vpop.eup %1935  ;;  %1182 = vmatprep.subr.bf16.mxu1 %v1122_v23 }
 0x34b   : > { %v1938_v25 = vpop.eup %1937  ;;  %v1123_v27 = vpack.c.bf16 %v1936_v1, %v1932_v43  ;;  %1183 = vmatpush1.bf16.msra.mxu1 %v1121_v8 }
 0x34c   : > { %v1940_v47 = vpop.eup %1939  ;;  %v1124_v32 = vpack.c.bf16 %v1938_v25, %v1934_v58 }
 0x34d   : > { %v1942_v42 = vpop.eup %1941 }
 0x34e   : > { %v1944_v29 = vpop.eup %1943  ;;  %v1126_v3 = vpack.c.bf16 %v3227_v34, %v1942_v42  ;;  %1184 = vmatprep.subr.bf16.mxu1 %v1124_v32  ;;  %v1128_v34 = vld [vmem:[#allocation3 + $0x8] sm:$0xff] }
 0x34f   : > { %v1125_v36 = vpack.c.bf16 %v1944_v29, %v1940_v47  ;;  %1185 = vmatpush1.bf16.msra.mxu1 %v1123_v27  ;;  %v1946_v45 = vpop.eup %1945 }
 0x350   : > { %1186 = vmatprep.subr.bf16.mxu1 %v1126_v3  ;;  %v1135_v28 = vrot.slane %v1946_v45, %v3736_v44  ;;  %v1139_v49 = vrot.slane %v1946_v45, %v3737_v48 }
 0x352   : > { %v1142_v31 = vmul.f32 %v1135_v28, %v1127_v7  ;;  %v1143_v0 = vmul.f32 %v1139_v49, %v1128_v34  ;;  %v1144_v11 = vmul.f32 %v1135_v28, %v1129_v51  ;;  %v1145_v4 = vmul.f32 %v1139_v49, %v1130_v38 }
 0x353   : > { %1187 = vmatpush1.bf16.msra.mxu1 %v1125_v36 }
 0x356   : > { %1189 = vmatmul.mubr.bf16.vlgmr.msra.gmra.mrb[0].mxu1 %v1814_v30 }
 0x357   : > { %1335 = vmatprep.mubr.bf16.mxu1 (!%p1624_p1), %v2329_v15 }
 0x3c0   : > { %v1348_v43 = vpop.permute.xlu0 (!%p1624_p1), %1347 }
 0x41a   : > { %v1287_v60 = vpop.f32.mrb[0].mxu0 (!%p1624_p1) }
 0x41b   : > { %v1289_v22 = vpop.f32.mrb[1].mxu0 (!%p1624_p1) }
 0x41c   : > { %v1291_v14 = vpop.f32.mrb[2].mxu0 (!%p1624_p1) }
 0x41d   : > { %v1292_v63 = vpop.f32.mrb[3].mxu0 (!%p1624_p1) }
 0x429   : > { %v1190_v9 = vpop.f32.mrb[0].mxu1  ;;  %1215 = sbr.rel (%p1624_p1) target bundleno = 1320 (0x528), region = 84 }
 0x42a   : > { %v1199_v53 = vadd.f32 %v1190_v9, %v1142_v31  ;;  %v1192_v46 = vpop.f32.mrb[1].mxu1 }
 0x42b   : > { %v1200_v33 = vadd.f32 %v1192_v46, %v1143_v0  ;;  %v1194_v56 = vpop.f32.mrb[2].mxu1 }
 0x42c   : > { %1203 = vst [vmem:[#allocation3] sm:$0xff] %v1199_v53  ;;  %v1201_v55 = vadd.f32 %v1194_v56, %v1144_v11  ;;  %v1196_v62 = vpop.f32.mrb[3].mxu1 }
 0x42d   : > { %1204 = vst [vmem:[#allocation3 + $0x8] sm:$0xff] %v1200_v33  ;;  %v1202_v13 = vadd.f32 %v1196_v62, %v1145_v4 }
 0x42e   : > { %1205 = vst [vmem:[#allocation3 + $0x10] sm:$0x1] %v1201_v55 }
 0x42f   : > { %1206 = vst [vmem:[#allocation3 + $0x18] sm:$0x1] %v1202_v13 }
 0x433   : > { %v1216_v17 = vld [vmem:[#allocation3] sm:$0xff] }
 0x434   : > { %v1217_v52 = vld [vmem:[#allocation3 + $0x8] sm:$0xff] }
 0x436   : > { %v1219_v12 = vld [vmem:[#allocation3 + $0x10] ss:$8 sm:$0x3] }
 0x437   : > { %1950 = vrcp.f32 %v1219_v12 }
 0x441   : > { %v1951_v50 = vpop.eup %1950 }
 0x442   : > { %v1229_v26 = vrot.slane %v1951_v50, %v3738_v59  ;;  %v1225_v19 = vrot.slane %v1951_v50, %v3739_v39 }
 0x444   : > { %v1233_v24 = vmul.f32 %v1229_v26, %v1217_v52  ;;  %v1232_v61 = vmul.f32 %v1225_v19, %v1216_v17 }
 0x446   : > { %v1236_v6 = vpack.c.bf16 %v1233_v24, %v1233_v24  ;;  %v1235_v54 = vpack.c.bf16 %v1232_v61, %v1232_v61 }
 0x448   : > { %1629 = vmatprep.subr.msk.bf16.mxu1 %vm595_vm1, %v1236_v6  ;;  %v1298_v41 = vsel %vm595_vm1, %v1235_v54, 0 }
 0x449   : > { %1304 = vmatpush1.bf16.msra.mxu1 %v1298_v41 }
 0x44c   : > { %1630 = vmatmul.mubr.msk.bf16.vlgmr.msra.gmra.mrb[0].mxu1 %vm546_vm2, %v1234_v21 }
 0x51f   : > { %v1337_v8 = vpop.f32.mrb[0].mxu1 }
 0x520   : > { %v1338_v23 = vadd.f32 %v1337_v8, %v1287_v60  ;;  %v1339_v58 = vpop.f32.mrb[1].mxu1 }
 0x521   : > { %v1340_v1 = vadd.f32 %v1339_v58, %v1289_v22  ;;  %v1341_v25 = vpop.f32.mrb[2].mxu1 }
 0x522   : > { %v1350_v27 = vadd.f32 %v1348_v43, %v1338_v23  ;;  %v1342_v47 = vpop.f32.mrb[3].mxu1 }
 0x523   : > { %v1351_v32 = vadd.f32 %v1348_v43, %v1340_v1 }
 0x524   : > { %v1352_v42 = vmax.f32 %v1350_v27, 0.0 }
 0x525   : > { %v1353_v29 = vmax.f32 %v1351_v32, 0.0 }
 0x526   : > { %1354 = vst [vmem:[%s2815_s10] sm:$0xff] %v1352_v42 }
 0x527   : > { %1355 = vst [vmem:[%s2815_s10 + $0x8] sm:$0xff] %v1353_v29 }
 0x528 PF: > { %s3740_s15 = sld [smem:[#allocation27_spill]]  ;;  %s3741_s16 = sld [smem:[#allocation28_spill]] }
 0x529   : > { %s3742_s19 = sld [smem:[#allocation35_spill]]  ;;  %s1373_s1 = sshll.u32 %s2815_s10, 4  ;;  %s3401_s1 = int_to_ptr.vmem [resolvable:$true] %s1373_s1 }
 0x52a   : > { %s3743_s24 = sld [smem:[#allocation69_spill]]  ;;  %s1357_s4 = scalar_lea.sflag [#allocation6], %s2774_s27 }
 0x52b   : > { %s2156_s14 = scalar_lea.vmem %s3401_s1, 256  ;;  %s2330_s23 = smov [#allocation16]  }
 0x52c   : > { %p2157_p8 = scmp.ne.s32.totalorder %s3401_s1, %s2156_s14  ;;  %s2160_s9 = sshll.u32 %s2330_s23, 4  ;;  %s2161_s9 = int_to_ptr.vmem [resolvable:$false] %s2160_s9 }
 0x52d   : > { %s2162_s10 = scalar_lea.vmem %s2161_s9, 512  ;;  %p2163_p3 = scmp.lt.s32.totalorder %s3401_s1, %s2161_s9 }
 0x52e   : > { %s1632_s22 = sshll.u32 %s3740_s15, 1  ;;  %s1633_s17 = sshll.u32 %s3741_s16, 2 }
 0x52f   : > { %s1369_s8 = sadd.s32 %s1633_s17, %s1632_s22  ;;  %p3745_p6 = scmp.ne.s32.totalorder %s3742_s19, 0 }
 0x530   : > { %s1634_s20 = sshll.u32 %s1369_s8, 7  ;;  %s3744_s18 = smov %s3743_s24 }
 0x531   : > { %s1371_s25 = scalar_lea.hbm %s3743_s24, %s1634_s20  ;;  %p2158_p12 = pnand %p2157_p8, %p3745_p6 }
 0x532   : > { %p2164_p2 = scmp.lt.s32.totalorder %s2162_s10, %s2156_s14 }
 0x533   : > { %p2159_p9 = pneg %p2158_p12 }
 0x534   : > { %p2165_p7 = por %p2164_p2, %p2163_p3 }
 0x536   : > { %p2166_p4 = pnand %p2165_p7, %p2159_p9 }
 0x538   : > { %2169 = shalt.err (!%p2166_p4)
}
 0x539   : > { %s2170_s5 = scalar_lea.hbm %s1371_s25, 256  ;;  %s2174_s15 = scalar_lea.hbm %s3744_s18, 1024 }
 0x53a   : > { %p2171_p13 = scmp.ne.s32.totalorder %s1371_s25, %s2170_s5  ;;  %p2175_p10 = scmp.lt.u32.totalorder %s1371_s25, %s3744_s18 }
 0x53b   : > { %p2176_p11 = scmp.lt.u32.totalorder %s2174_s15, %s2170_s5  ;;  %p2178_p8 = scmp.lt.u32.totalorder %s2170_s5, %s1371_s25 }
 0x53c   : > { %p2172_p5 = pnand %p2171_p13, %p3745_p6 }
 0x53d   : > { %p2177_p1 = por %p2176_p11, %p2175_p10 }
 0x53e   : > { %p2173_p0 = pneg %p2172_p5 }
 0x53f   : > { %p2179_p12 = por %p2178_p8, %p2177_p1 }
 0x541   : > { %p2180_p9 = pnand %p2179_p12, %p2173_p0 }
 0x543   : > { %2183 = shalt.err (!%p2180_p9)
}
 0x544   : > { %1659 = dma.vmem_to_hbm [thread:$0]  (%p3745_p6), %s3401_s1, 256, %s1371_s25, %s1357_s4  }
 0x545 PF: > { %s3746_s17 = sld [smem:[#allocation25_spill]]  ;;  %p1695_p3 = scmp.ge.s32.totalorder %s2314_s13, 2 }
 0x546   : > { %p3747_p2 = scmp.ne.s32.totalorder %s3582_s7, 0 }
 0x548   : > { %p1685_p7 = pnand %p1695_p3, %p3747_p2 }
 0x54b   : > { %s1385_s8 = sand.u32 1, %s3746_s17  }
 0x54c   : > { %s1386_s20 = scalar_lea.sflag [#allocation6], %s1385_s8 }
 0x54d   : > { %2261 = dma.done.wait (!%p1685_p7), %s1386_s20, 256  }
 0x54e   : > { %2263 = vsyncadd (!%p1685_p7), %s1386_s20, 4294967040  ;;  %s30_s13 = sadd.s32 1, %s2314_s13   ;;  %s3749_s24 = sld [smem:[#allocation24_spill]] }
 0x54f   : > { %p3428_p4 = scmp.ge.s32.totalorder %s30_s13, 10   ;;  %s3750_s19 = sld [smem:[#allocation36_spill]] }
 0x550   : > { %s3751_s1 = sld [smem:[#allocation37_spill]]  ;;  %s3752_s21 = sld [smem:[#allocation29_spill]] }
 0x551   : > { %s3753_s8 = sld [smem:[#allocation30_spill]]  ;;  %s3754_s10 = sld [smem:[#allocation32_spill]] }
 0x552   : > { %s3755_s11 = sld [smem:[#allocation33_spill]]  ;;  %s3756_s7 = sld [smem:[#allocation34_spill]] }
 0x553   : > { %s3758_s25 = smov %s2274_s26  ;;  %s3760_s27 = smov %s2282_s28 }
 0x554   : > { %s3761_s28 = smov %s2286_s29  ;;  %s3764_s9 = smov %s2310_s12 }
 0x555   : > { %s3759_s26 = smov %s3750_s19  ;;  %29 = sbr.rel (!%p3428_p4) target bundleno = 20 (0x14), region = 153 }
 0x556   : > { %s3762_s29 = smov %s3751_s1  ;;  %s3763_s30 = smov %s3752_s21 }
 0x558   : > { %s3765_s12 = smov %s3756_s7 }
 0x55c   :  { %1391 = vsyncpa [#allocation5], 1 }
 0x55d   :  { %1393 = vsyncpa [#allocation5 + $0x1], 1 }
 0x55e   :  { %1394 = vsyncpa [#allocation8], 1 }
 0x55f   :  { %1396 = vsyncpa [#allocation8 + $0x1], 1 }
 0x560   :  { %1397 = vsyncpa [#allocation11], 1 }
 0x561   :  { %1399 = vsyncpa [#allocation11 + $0x1], 1 }
 0x562   :  { %1400 = vsyncpa [#allocation14], 1 }
 0x563   :  { %1401 = vsyncpa [#allocation6], 1 }
 0x564   :  { %1403 = vsyncpa [#allocation6 + $0x1], 1 }

</bundles_post_ra>
